<compile_context>
chip_gen: v7x
topology: tpu7x:2x2x1
jax: 0.10.0
libtpu: 0.0.40
codegen_flags: <defaults>
</compile_context>

<pallas_src>
import jax
import jax.numpy as jnp
from jax.experimental import pallas as pl
from jax.experimental.pallas import tpu as pltpu

HIDDEN = 128     # LSTM hidden size (fixed by the nn.Module)
LANE = 128       # TPU lane width
SUBLANE = 8      # f32 sublanes per vreg


def _round_up(x, m):
    return (x + m - 1) // m * m


def lstm_classify_kernel(tok_ref, embp_ref, whh_ref, wcls_ref, bcls_ref, out_ref):
    """Whole LSTM recurrence + classifier, single invocation, fully VMEM-resident.

    tok_ref  : (B, T)       int32 token ids (batch pre-padded to a sublane multiple)
    embp_ref : (V_pad, 4H)  projected embedding table  E @ W_ih^T   (f32 or bf16)
    whh_ref  : (H, 4H)      W_hh^T, always f32 (recurrent matmul stays f32)
    wcls_ref : (H, C_pad)   classifier weights, lane-padded          (f32 or bf16)
    bcls_ref : (1, C_pad)   classifier bias, f32, lane-padded
    out_ref  : (B, C_pad)   logits, f32
    """
    toks = tok_ref[...]                           # (B, T) int32
    B, T = toks.shape
    H = whh_ref.shape[0]
    V_pad = embp_ref.shape[0]
    embp = embp_ref[...]                          # (V_pad, 4H)
    whh = whh_ref[...]                            # (H, 4H), f32

    # ---- Hoisted input projection (embedding lookup fused as one-hot MXU matmuls).
    # None of this depends on h, so it runs off the serial critical path.
    # For a large vocabulary, swap this for a wrapper-side jnp.take from the
    # projected table instead of a one-hot matmul.
    iota_v = jax.lax.broadcasted_iota(jnp.int32, (B, V_pad), 1)
    xproj = []
    for t in range(T):
        onehot = (toks[:, t:t + 1] == iota_v).astype(embp.dtype)       # (B, V_pad)
        xproj.append(jnp.dot(onehot, embp,
                             preferred_element_type=jnp.float32))      # (B, 4H) f32

    # ---- Recurrence: gates = xproj_t + h @ W_hh^T   (PyTorch gate order i, f, g, o).
    # K = 128 aligned, no concat, no per-step cast of h; element-wise math in f32.
    h = jnp.zeros((B, H), jnp.float32)
    c = jnp.zeros((B, H), jnp.float32)
    for t in range(T):                            # T small & static -> fully unrolled
        gates = xproj[t] + jnp.dot(h, whh, preferred_element_type=jnp.float32)
        i_g = jax.nn.sigmoid(gates[:, 0 * H:1 * H])
        f_g = jax.nn.sigmoid(gates[:, 1 * H:2 * H])
        g_g = jnp.tanh(gates[:, 2 * H:3 * H])
        o_g = jax.nn.sigmoid(gates[:, 3 * H:4 * H])
        c = f_g * c + i_g * g_g
        h = o_g * jnp.tanh(c)
    # TODO(synk): for sentence_length >~ 32, switch this unroll to lax.fori_loop with a
    # modest unroll factor to bound code size / compile time.

    # ---- Classifier: h is cast (at most) once here, off the recurrence loop.
    logits = (jnp.dot(h.astype(wcls_ref.dtype), wcls_ref[...],
                      preferred_element_type=jnp.float32) + bcls_ref[...])
    out_ref[...] = logits.astype(out_ref.dtype)   # lane- and sublane-dense store


def prepare_params(params, use_bf16_matmul=False):
    """One-time weight preparation — keeps the per-inference call path minimal.

    use_bf16_matmul=True halves weight bytes / MXU K-passes for the projected-embedding
    and classifier matmuls and is safe on v5e, v6e and v7x alike: the recurrent matmul
    and all element-wise gate math remain f32, so the recurrent state never sees bf16
    rounding.
    """
    emb_table, w_ih, w_hh, w_cls, b_cls = params
    vocab = emb_table.shape[0]
    H = HIDDEN
    C = w_cls.shape[0]
    V_pad = _round_up(vocab, LANE)
    C_pad = _round_up(C, LANE)
    mm_dtype = jnp.bfloat16 if use_bf16_matmul else jnp.float32

    # Embedding followed by the LSTM input projection == a lookup in a projected table.
    emb_proj = jnp.dot(emb_table.astype(jnp.float32), jnp.transpose(w_ih))   # (V, 4H)
    emb_proj_pad = jnp.zeros((V_pad, 4 * H), jnp.float32).at[:vocab].set(emb_proj)

    w_hh_t = jnp.transpose(w_hh).astype(jnp.float32)                          # (H, 4H)
    w_cls_pad = jnp.zeros((H, C_pad), jnp.float32).at[:, :C].set(jnp.transpose(w_cls))
    b_cls_pad = jnp.zeros((1, C_pad), jnp.float32).at[:, :C].set(b_cls[None, :])

    return {
        "emb_proj": emb_proj_pad.astype(mm_dtype),
        "w_hh_t": w_hh_t,                                  # always f32
        "w_cls": w_cls_pad.astype(mm_dtype),
        "b_cls": b_cls_pad,                                # f32
        "num_classes": C,
    }


def torch_model_forward(x_tokens, prepped):
    """x_tokens: (B, T) int32 token ids. Returns logits (B, sentence_length + 1)."""
    B, T = x_tokens.shape
    C = prepped["num_classes"]
    C_pad = prepped["b_cls"].shape[1]
    B_pad = _round_up(B, SUBLANE)

    # Pad the batch to a full f32 sublane tile (pad rows reuse token 0; sliced off below).
    tok_pad = jnp.zeros((B_pad, T), jnp.int32).at[:B, :].set(x_tokens.astype(jnp.int32))

    vmem = pl.BlockSpec(memory_space=pltpu.MemorySpace.VMEM)
    out_padded = pl.pallas_call(
        lstm_classify_kernel,
        out_shape=jax.ShapeDtypeStruct((B_pad, C_pad), jnp.float32),
        in_specs=[vmem, vmem, vmem, vmem, vmem],
        out_specs=vmem,
    )(tok_pad, prepped["emb_proj"], prepped["w_hh_t"],
      prepped["w_cls"], prepped["b_cls"])
    # TODO(synk): for large batches, add a batch-block grid axis with
    # dimension_semantics=("parallel",) so v7x's two TensorCores each run an
    # independent batch slice, and switch to a blocked BlockSpec pipeline (plus
    # vmem_limit_bytes) once activations outgrow VMEM (64 MiB on v7x).

    return out_padded[:B, :C]


def init_params(key, vocab_size, vector_dim, sentence_length):
    """Deterministic synthetic parameters matching the nn.Module shapes."""
    k_emb, k_ih, k_hh, k_w, k_b = jax.random.split(key, 5)
    num_classes = sentence_length + 1
    emb_table = jax.random.normal(k_emb, (vocab_size, vector_dim), jnp.float32)
    # nn.LSTM(vector_dim, 128, bias=False): weight_ih_l0 (4H, D), weight_hh_l0 (4H, H)
    w_ih = jax.random.normal(k_ih, (4 * HIDDEN, vector_dim), jnp.float32) * 0.1
    w_hh = jax.random.normal(k_hh, (4 * HIDDEN, HIDDEN), jnp.float32) * 0.1
    # nn.Linear(128, sentence_length + 1)
    w_cls = jax.random.normal(k_w, (num_classes, HIDDEN), jnp.float32) * 0.1
    b_cls = jax.random.normal(k_b, (num_classes,), jnp.float32) * 0.1
    return emb_table, w_ih, w_hh, w_cls, b_cls
    # TODO(synk): cross-entropy training loss (y is not None branch) not implemented;
    # this script reproduces the inference path (y_pred).


def _reference_forward(x_tokens, params):
    """Pure-JAX reference of the PyTorch forward (for a correctness check)."""
    emb_table, w_ih, w_hh, w_cls, b_cls = params
    hp = jax.lax.Precision.HIGHEST
    x = jnp.take(emb_table, x_tokens, axis=0).astype(jnp.float32)     # (B, T, D)
    B, T, _ = x.shape
    H = HIDDEN
    h = jnp.zeros((B, H), jnp.float32)
    c = jnp.zeros((B, H), jnp.float32)
    for t in range(T):
        gates = (jnp.dot(x[:, t, :], jnp.transpose(w_ih), precision=hp)
                 + jnp.dot(h, jnp.transpose(w_hh), precision=hp))
        i_g = jax.nn.sigmoid(gates[:, 0 * H:1 * H])
        f_g = jax.nn.sigmoid(gates[:, 1 * H:2 * H])
        g_g = jnp.tanh(gates[:, 2 * H:3 * H])
        o_g = jnp.tanh(gates[:, 3 * H:4 * H]) * 0 + jax.nn.sigmoid(gates[:, 3 * H:4 * H])
        c = f_g * c + i_g * g_g
        h = o_g * jnp.tanh(c)
    return jnp.dot(h, jnp.transpose(w_cls), precision=hp) + b_cls[None, :]


if __name__ == "__main__":
    vector_dim = 32
    sentence_length = 8
    vocab_size = 20
    batch = 2   # wrapper pads to 8 sublanes; in production use batch >= 8 (ideally >= 128)

    key = jax.random.PRNGKey(0)
    k_params, k_tokens = jax.random.split(key)
    params = init_params(k_params, vocab_size, vector_dim, sentence_length)
    x_tokens = jax.random.randint(k_tokens, (batch, sentence_length), 0, vocab_size,
                                  dtype=jnp.int32)

    prepped = prepare_params(params, use_bf16_matmul=False)   # bf16 OK on v5e/v6e/v7x
    logits = torch_model_forward(x_tokens, prepped)
    jax.block_until_ready(logits)

    assert logits.shape == (batch, sentence_length + 1)
    assert bool(jnp.all(jnp.isfinite(logits)))
    ref = _reference_forward(x_tokens, params)
    assert bool(jnp.allclose(logits, ref, atol=5e-2, rtol=5e-2))
    print("KERNEL_OK")
</pallas_src>

<mosaic_0001>
module attributes {stable_mosaic.version = 11 : i64} {
  func.func @lstm_classify_kernel(%arg0: memref<8x8xi32, #tpu.memory_space<vmem>>, %arg1: memref<128x512xf32, #tpu.memory_space<vmem>>, %arg2: memref<128x512xf32, #tpu.memory_space<vmem>>, %arg3: memref<128x128xf32, #tpu.memory_space<vmem>>, %arg4: memref<1x128xf32, #tpu.memory_space<vmem>>, %arg5: memref<8x128xf32, #tpu.memory_space<vmem>>) attributes {dimension_semantics = [], scalar_prefetch = 0 : i64, scratch_operands = 0 : i64, tpu.core_type = #tpu.core_type<tc>} {
    %c0 = arith.constant 0 : index
    %c0_0 = arith.constant 0 : index
    %0 = vector.load %arg0[%c0, %c0_0] : memref<8x8xi32, #tpu.memory_space<vmem>>, vector<8x8xi32>
    %c0_1 = arith.constant 0 : index
    %c0_2 = arith.constant 0 : index
    %1 = vector.load %arg1[%c0_1, %c0_2] : memref<128x512xf32, #tpu.memory_space<vmem>>, vector<128x512xf32>
    %c0_3 = arith.constant 0 : index
    %c0_4 = arith.constant 0 : index
    %2 = vector.load %arg2[%c0_3, %c0_4] : memref<128x512xf32, #tpu.memory_space<vmem>>, vector<128x512xf32>
    %3 = tpu.iota {dimensions = array<i32: 1>} : vector<8x128xi32>
    %4 = vector.extract_strided_slice %0 {offsets = [0, 0], sizes = [8, 1], strides = [1, 1]} : vector<8x8xi32> to vector<8x1xi32>
    %5 = vector.broadcast %4 : vector<8x1xi32> to vector<8x128xi32>
    %6 = arith.cmpi eq, %5, %3 : vector<8x128xi32>
    %7 = arith.extui %6 : vector<8x128xi1> to vector<8x128xi32>
    %8 = arith.sitofp %7 : vector<8x128xi32> to vector<8x128xf32>
    %cst = arith.constant dense<0.000000e+00> : vector<8x512xf32>
    %9 = tpu.matmul %8, %1, %cst {dimension_numbers = #tpu.dot_dimension_numbers<[1], [0], [0], [1], [0, 0, 1, 1], [], []>} : vector<8x128xf32>, vector<128x512xf32>, vector<8x512xf32> -> vector<8x512xf32>
    %10 = vector.extract_strided_slice %0 {offsets = [0, 1], sizes = [8, 1], strides = [1, 1]} : vector<8x8xi32> to vector<8x1xi32>
    %11 = vector.broadcast %10 : vector<8x1xi32> to vector<8x128xi32>
    %12 = arith.cmpi eq, %11, %3 : vector<8x128xi32>
    %13 = arith.extui %12 : vector<8x128xi1> to vector<8x128xi32>
    %14 = arith.sitofp %13 : vector<8x128xi32> to vector<8x128xf32>
    %cst_5 = arith.constant dense<0.000000e+00> : vector<8x512xf32>
    %15 = tpu.matmul %14, %1, %cst_5 {dimension_numbers = #tpu.dot_dimension_numbers<[1], [0], [0], [1], [0, 0, 1, 1], [], []>} : vector<8x128xf32>, vector<128x512xf32>, vector<8x512xf32> -> vector<8x512xf32>
    %16 = vector.extract_strided_slice %0 {offsets = [0, 2], sizes = [8, 1], strides = [1, 1]} : vector<8x8xi32> to vector<8x1xi32>
    %17 = vector.broadcast %16 : vector<8x1xi32> to vector<8x128xi32>
    %18 = arith.cmpi eq, %17, %3 : vector<8x128xi32>
    %19 = arith.extui %18 : vector<8x128xi1> to vector<8x128xi32>
    %20 = arith.sitofp %19 : vector<8x128xi32> to vector<8x128xf32>
    %cst_6 = arith.constant dense<0.000000e+00> : vector<8x512xf32>
    %21 = tpu.matmul %20, %1, %cst_6 {dimension_numbers = #tpu.dot_dimension_numbers<[1], [0], [0], [1], [0, 0, 1, 1], [], []>} : vector<8x128xf32>, vector<128x512xf32>, vector<8x512xf32> -> vector<8x512xf32>
    %22 = vector.extract_strided_slice %0 {offsets = [0, 3], sizes = [8, 1], strides = [1, 1]} : vector<8x8xi32> to vector<8x1xi32>
    %23 = vector.broadcast %22 : vector<8x1xi32> to vector<8x128xi32>
    %24 = arith.cmpi eq, %23, %3 : vector<8x128xi32>
    %25 = arith.extui %24 : vector<8x128xi1> to vector<8x128xi32>
    %26 = arith.sitofp %25 : vector<8x128xi32> to vector<8x128xf32>
    %cst_7 = arith.constant dense<0.000000e+00> : vector<8x512xf32>
    %27 = tpu.matmul %26, %1, %cst_7 {dimension_numbers = #tpu.dot_dimension_numbers<[1], [0], [0], [1], [0, 0, 1, 1], [], []>} : vector<8x128xf32>, vector<128x512xf32>, vector<8x512xf32> -> vector<8x512xf32>
    %28 = vector.extract_strided_slice %0 {offsets = [0, 4], sizes = [8, 1], strides = [1, 1]} : vector<8x8xi32> to vector<8x1xi32>
    %29 = vector.broadcast %28 : vector<8x1xi32> to vector<8x128xi32>
    %30 = arith.cmpi eq, %29, %3 : vector<8x128xi32>
    %31 = arith.extui %30 : vector<8x128xi1> to vector<8x128xi32>
    %32 = arith.sitofp %31 : vector<8x128xi32> to vector<8x128xf32>
    %cst_8 = arith.constant dense<0.000000e+00> : vector<8x512xf32>
    %33 = tpu.matmul %32, %1, %cst_8 {dimension_numbers = #tpu.dot_dimension_numbers<[1], [0], [0], [1], [0, 0, 1, 1], [], []>} : vector<8x128xf32>, vector<128x512xf32>, vector<8x512xf32> -> vector<8x512xf32>
    %34 = vector.extract_strided_slice %0 {offsets = [0, 5], sizes = [8, 1], strides = [1, 1]} : vector<8x8xi32> to vector<8x1xi32>
    %35 = vector.broadcast %34 : vector<8x1xi32> to vector<8x128xi32>
    %36 = arith.cmpi eq, %35, %3 : vector<8x128xi32>
    %37 = arith.extui %36 : vector<8x128xi1> to vector<8x128xi32>
    %38 = arith.sitofp %37 : vector<8x128xi32> to vector<8x128xf32>
    %cst_9 = arith.constant dense<0.000000e+00> : vector<8x512xf32>
    %39 = tpu.matmul %38, %1, %cst_9 {dimension_numbers = #tpu.dot_dimension_numbers<[1], [0], [0], [1], [0, 0, 1, 1], [], []>} : vector<8x128xf32>, vector<128x512xf32>, vector<8x512xf32> -> vector<8x512xf32>
    %40 = vector.extract_strided_slice %0 {offsets = [0, 6], sizes = [8, 1], strides = [1, 1]} : vector<8x8xi32> to vector<8x1xi32>
    %41 = vector.broadcast %40 : vector<8x1xi32> to vector<8x128xi32>
    %42 = arith.cmpi eq, %41, %3 : vector<8x128xi32>
    %43 = arith.extui %42 : vector<8x128xi1> to vector<8x128xi32>
    %44 = arith.sitofp %43 : vector<8x128xi32> to vector<8x128xf32>
    %cst_10 = arith.constant dense<0.000000e+00> : vector<8x512xf32>
    %45 = tpu.matmul %44, %1, %cst_10 {dimension_numbers = #tpu.dot_dimension_numbers<[1], [0], [0], [1], [0, 0, 1, 1], [], []>} : vector<8x128xf32>, vector<128x512xf32>, vector<8x512xf32> -> vector<8x512xf32>
    %46 = vector.extract_strided_slice %0 {offsets = [0, 7], sizes = [8, 1], strides = [1, 1]} : vector<8x8xi32> to vector<8x1xi32>
    %47 = vector.broadcast %46 : vector<8x1xi32> to vector<8x128xi32>
    %48 = arith.cmpi eq, %47, %3 : vector<8x128xi32>
    %49 = arith.extui %48 : vector<8x128xi1> to vector<8x128xi32>
    %50 = arith.sitofp %49 : vector<8x128xi32> to vector<8x128xf32>
    %cst_11 = arith.constant dense<0.000000e+00> : vector<8x512xf32>
    %51 = tpu.matmul %50, %1, %cst_11 {dimension_numbers = #tpu.dot_dimension_numbers<[1], [0], [0], [1], [0, 0, 1, 1], [], []>} : vector<8x128xf32>, vector<128x512xf32>, vector<8x512xf32> -> vector<8x512xf32>
    %cst_12 = arith.constant 0.000000e+00 : f32
    %52 = vector.broadcast %cst_12 : f32 to vector<8x128xf32>
    %cst_13 = arith.constant 0.000000e+00 : f32
    %53 = vector.broadcast %cst_13 : f32 to vector<8x128xf32>
    %cst_14 = arith.constant dense<0.000000e+00> : vector<8x512xf32>
    %54 = tpu.matmul %52, %2, %cst_14 {dimension_numbers = #tpu.dot_dimension_numbers<[1], [0], [0], [1], [0, 0, 1, 1], [], []>} : vector<8x128xf32>, vector<128x512xf32>, vector<8x512xf32> -> vector<8x512xf32>
    %55 = arith.addf %9, %54 : vector<8x512xf32>
    %56 = vector.extract_strided_slice %55 {offsets = [0, 0], sizes = [8, 128], strides = [1, 1]} : vector<8x512xf32> to vector<8x128xf32>
    %57 = arith.negf %56 : vector<8x128xf32>
    %58 = math.exp %57 : vector<8x128xf32>
    %cst_15 = arith.constant 1.000000e+00 : f32
    %59 = vector.broadcast %cst_15 : f32 to vector<8x128xf32>
    %60 = arith.addf %59, %58 : vector<8x128xf32>
    %61 = arith.divf %59, %60 : vector<8x128xf32>
    %62 = vector.extract_strided_slice %55 {offsets = [0, 128], sizes = [8, 128], strides = [1, 1]} : vector<8x512xf32> to vector<8x128xf32>
    %63 = arith.negf %62 : vector<8x128xf32>
    %64 = math.exp %63 : vector<8x128xf32>
    %cst_16 = arith.constant 1.000000e+00 : f32
    %65 = vector.broadcast %cst_16 : f32 to vector<8x128xf32>
    %66 = arith.addf %65, %64 : vector<8x128xf32>
    %67 = arith.divf %65, %66 : vector<8x128xf32>
    %68 = vector.extract_strided_slice %55 {offsets = [0, 256], sizes = [8, 128], strides = [1, 1]} : vector<8x512xf32> to vector<8x128xf32>
    %69 = math.tanh %68 : vector<8x128xf32>
    %70 = vector.extract_strided_slice %55 {offsets = [0, 384], sizes = [8, 128], strides = [1, 1]} : vector<8x512xf32> to vector<8x128xf32>
    %71 = arith.negf %70 : vector<8x128xf32>
    %72 = math.exp %71 : vector<8x128xf32>
    %cst_17 = arith.constant 1.000000e+00 : f32
    %73 = vector.broadcast %cst_17 : f32 to vector<8x128xf32>
    %74 = arith.addf %73, %72 : vector<8x128xf32>
    %75 = arith.divf %73, %74 : vector<8x128xf32>
    %76 = arith.mulf %67, %53 : vector<8x128xf32>
    %77 = arith.mulf %61, %69 : vector<8x128xf32>
    %78 = arith.addf %76, %77 : vector<8x128xf32>
    %79 = math.tanh %78 : vector<8x128xf32>
    %80 = arith.mulf %75, %79 : vector<8x128xf32>
    %cst_18 = arith.constant dense<0.000000e+00> : vector<8x512xf32>
    %81 = tpu.matmul %80, %2, %cst_18 {dimension_numbers = #tpu.dot_dimension_numbers<[1], [0], [0], [1], [0, 0, 1, 1], [], []>} : vector<8x128xf32>, vector<128x512xf32>, vector<8x512xf32> -> vector<8x512xf32>
    %82 = arith.addf %15, %81 : vector<8x512xf32>
    %83 = vector.extract_strided_slice %82 {offsets = [0, 0], sizes = [8, 128], strides = [1, 1]} : vector<8x512xf32> to vector<8x128xf32>
    %84 = arith.negf %83 : vector<8x128xf32>
    %85 = math.exp %84 : vector<8x128xf32>
    %cst_19 = arith.constant 1.000000e+00 : f32
    %86 = vector.broadcast %cst_19 : f32 to vector<8x128xf32>
    %87 = arith.addf %86, %85 : vector<8x128xf32>
    %88 = arith.divf %86, %87 : vector<8x128xf32>
    %89 = vector.extract_strided_slice %82 {offsets = [0, 128], sizes = [8, 128], strides = [1, 1]} : vector<8x512xf32> to vector<8x128xf32>
    %90 = arith.negf %89 : vector<8x128xf32>
    %91 = math.exp %90 : vector<8x128xf32>
    %cst_20 = arith.constant 1.000000e+00 : f32
    %92 = vector.broadcast %cst_20 : f32 to vector<8x128xf32>
    %93 = arith.addf %92, %91 : vector<8x128xf32>
    %94 = arith.divf %92, %93 : vector<8x128xf32>
    %95 = vector.extract_strided_slice %82 {offsets = [0, 256], sizes = [8, 128], strides = [1, 1]} : vector<8x512xf32> to vector<8x128xf32>
    %96 = math.tanh %95 : vector<8x128xf32>
    %97 = vector.extract_strided_slice %82 {offsets = [0, 384], sizes = [8, 128], strides = [1, 1]} : vector<8x512xf32> to vector<8x128xf32>
    %98 = arith.negf %97 : vector<8x128xf32>
    %99 = math.exp %98 : vector<8x128xf32>
    %cst_21 = arith.constant 1.000000e+00 : f32
    %100 = vector.broadcast %cst_21 : f32 to vector<8x128xf32>
    %101 = arith.addf %100, %99 : vector<8x128xf32>
    %102 = arith.divf %100, %101 : vector<8x128xf32>
    %103 = arith.mulf %94, %78 : vector<8x128xf32>
    %104 = arith.mulf %88, %96 : vector<8x128xf32>
    %105 = arith.addf %103, %104 : vector<8x128xf32>
    %106 = math.tanh %105 : vector<8x128xf32>
    %107 = arith.mulf %102, %106 : vector<8x128xf32>
    %cst_22 = arith.constant dense<0.000000e+00> : vector<8x512xf32>
    %108 = tpu.matmul %107, %2, %cst_22 {dimension_numbers = #tpu.dot_dimension_numbers<[1], [0], [0], [1], [0, 0, 1, 1], [], []>} : vector<8x128xf32>, vector<128x512xf32>, vector<8x512xf32> -> vector<8x512xf32>
    %109 = arith.addf %21, %108 : vector<8x512xf32>
    %110 = vector.extract_strided_slice %109 {offsets = [0, 0], sizes = [8, 128], strides = [1, 1]} : vector<8x512xf32> to vector<8x128xf32>
    %111 = arith.negf %110 : vector<8x128xf32>
    %112 = math.exp %111 : vector<8x128xf32>
    %cst_23 = arith.constant 1.000000e+00 : f32
    %113 = vector.broadcast %cst_23 : f32 to vector<8x128xf32>
    %114 = arith.addf %113, %112 : vector<8x128xf32>
    %115 = arith.divf %113, %114 : vector<8x128xf32>
    %116 = vector.extract_strided_slice %109 {offsets = [0, 128], sizes = [8, 128], strides = [1, 1]} : vector<8x512xf32> to vector<8x128xf32>
    %117 = arith.negf %116 : vector<8x128xf32>
    %118 = math.exp %117 : vector<8x128xf32>
    %cst_24 = arith.constant 1.000000e+00 : f32
    %119 = vector.broadcast %cst_24 : f32 to vector<8x128xf32>
    %120 = arith.addf %119, %118 : vector<8x128xf32>
    %121 = arith.divf %119, %120 : vector<8x128xf32>
    %122 = vector.extract_strided_slice %109 {offsets = [0, 256], sizes = [8, 128], strides = [1, 1]} : vector<8x512xf32> to vector<8x128xf32>
    %123 = math.tanh %122 : vector<8x128xf32>
    %124 = vector.extract_strided_slice %109 {offsets = [0, 384], sizes = [8, 128], strides = [1, 1]} : vector<8x512xf32> to vector<8x128xf32>
    %125 = arith.negf %124 : vector<8x128xf32>
    %126 = math.exp %125 : vector<8x128xf32>
    %cst_25 = arith.constant 1.000000e+00 : f32
    %127 = vector.broadcast %cst_25 : f32 to vector<8x128xf32>
    %128 = arith.addf %127, %126 : vector<8x128xf32>
    %129 = arith.divf %127, %128 : vector<8x128xf32>
    %130 = arith.mulf %121, %105 : vector<8x128xf32>
    %131 = arith.mulf %115, %123 : vector<8x128xf32>
    %132 = arith.addf %130, %131 : vector<8x128xf32>
    %133 = math.tanh %132 : vector<8x128xf32>
    %134 = arith.mulf %129, %133 : vector<8x128xf32>
    %cst_26 = arith.constant dense<0.000000e+00> : vector<8x512xf32>
    %135 = tpu.matmul %134, %2, %cst_26 {dimension_numbers = #tpu.dot_dimension_numbers<[1], [0], [0], [1], [0, 0, 1, 1], [], []>} : vector<8x128xf32>, vector<128x512xf32>, vector<8x512xf32> -> vector<8x512xf32>
    %136 = arith.addf %27, %135 : vector<8x512xf32>
    %137 = vector.extract_strided_slice %136 {offsets = [0, 0], sizes = [8, 128], strides = [1, 1]} : vector<8x512xf32> to vector<8x128xf32>
    %138 = arith.negf %137 : vector<8x128xf32>
    %139 = math.exp %138 : vector<8x128xf32>
    %cst_27 = arith.constant 1.000000e+00 : f32
    %140 = vector.broadcast %cst_27 : f32 to vector<8x128xf32>
    %141 = arith.addf %140, %139 : vector<8x128xf32>
    %142 = arith.divf %140, %141 : vector<8x128xf32>
    %143 = vector.extract_strided_slice %136 {offsets = [0, 128], sizes = [8, 128], strides = [1, 1]} : vector<8x512xf32> to vector<8x128xf32>
    %144 = arith.negf %143 : vector<8x128xf32>
    %145 = math.exp %144 : vector<8x128xf32>
    %cst_28 = arith.constant 1.000000e+00 : f32
    %146 = vector.broadcast %cst_28 : f32 to vector<8x128xf32>
    %147 = arith.addf %146, %145 : vector<8x128xf32>
    %148 = arith.divf %146, %147 : vector<8x128xf32>
    %149 = vector.extract_strided_slice %136 {offsets = [0, 256], sizes = [8, 128], strides = [1, 1]} : vector<8x512xf32> to vector<8x128xf32>
    %150 = math.tanh %149 : vector<8x128xf32>
    %151 = vector.extract_strided_slice %136 {offsets = [0, 384], sizes = [8, 128], strides = [1, 1]} : vector<8x512xf32> to vector<8x128xf32>
    %152 = arith.negf %151 : vector<8x128xf32>
    %153 = math.exp %152 : vector<8x128xf32>
    %cst_29 = arith.constant 1.000000e+00 : f32
    %154 = vector.broadcast %cst_29 : f32 to vector<8x128xf32>
    %155 = arith.addf %154, %153 : vector<8x128xf32>
    %156 = arith.divf %154, %155 : vector<8x128xf32>
    %157 = arith.mulf %148, %132 : vector<8x128xf32>
    %158 = arith.mulf %142, %150 : vector<8x128xf32>
    %159 = arith.addf %157, %158 : vector<8x128xf32>
    %160 = math.tanh %159 : vector<8x128xf32>
    %161 = arith.mulf %156, %160 : vector<8x128xf32>
    %cst_30 = arith.constant dense<0.000000e+00> : vector<8x512xf32>
    %162 = tpu.matmul %161, %2, %cst_30 {dimension_numbers = #tpu.dot_dimension_numbers<[1], [0], [0], [1], [0, 0, 1, 1], [], []>} : vector<8x128xf32>, vector<128x512xf32>, vector<8x512xf32> -> vector<8x512xf32>
    %163 = arith.addf %33, %162 : vector<8x512xf32>
    %164 = vector.extract_strided_slice %163 {offsets = [0, 0], sizes = [8, 128], strides = [1, 1]} : vector<8x512xf32> to vector<8x128xf32>
    %165 = arith.negf %164 : vector<8x128xf32>
    %166 = math.exp %165 : vector<8x128xf32>
    %cst_31 = arith.constant 1.000000e+00 : f32
    %167 = vector.broadcast %cst_31 : f32 to vector<8x128xf32>
    %168 = arith.addf %167, %166 : vector<8x128xf32>
    %169 = arith.divf %167, %168 : vector<8x128xf32>
    %170 = vector.extract_strided_slice %163 {offsets = [0, 128], sizes = [8, 128], strides = [1, 1]} : vector<8x512xf32> to vector<8x128xf32>
    %171 = arith.negf %170 : vector<8x128xf32>
    %172 = math.exp %171 : vector<8x128xf32>
    %cst_32 = arith.constant 1.000000e+00 : f32
    %173 = vector.broadcast %cst_32 : f32 to vector<8x128xf32>
    %174 = arith.addf %173, %172 : vector<8x128xf32>
    %175 = arith.divf %173, %174 : vector<8x128xf32>
    %176 = vector.extract_strided_slice %163 {offsets = [0, 256], sizes = [8, 128], strides = [1, 1]} : vector<8x512xf32> to vector<8x128xf32>
    %177 = math.tanh %176 : vector<8x128xf32>
    %178 = vector.extract_strided_slice %163 {offsets = [0, 384], sizes = [8, 128], strides = [1, 1]} : vector<8x512xf32> to vector<8x128xf32>
    %179 = arith.negf %178 : vector<8x128xf32>
    %180 = math.exp %179 : vector<8x128xf32>
    %cst_33 = arith.constant 1.000000e+00 : f32
    %181 = vector.broadcast %cst_33 : f32 to vector<8x128xf32>
    %182 = arith.addf %181, %180 : vector<8x128xf32>
    %183 = arith.divf %181, %182 : vector<8x128xf32>
    %184 = arith.mulf %175, %159 : vector<8x128xf32>
    %185 = arith.mulf %169, %177 : vector<8x128xf32>
    %186 = arith.addf %184, %185 : vector<8x128xf32>
    %187 = math.tanh %186 : vector<8x128xf32>
    %188 = arith.mulf %183, %187 : vector<8x128xf32>
    %cst_34 = arith.constant dense<0.000000e+00> : vector<8x512xf32>
    %189 = tpu.matmul %188, %2, %cst_34 {dimension_numbers = #tpu.dot_dimension_numbers<[1], [0], [0], [1], [0, 0, 1, 1], [], []>} : vector<8x128xf32>, vector<128x512xf32>, vector<8x512xf32> -> vector<8x512xf32>
    %190 = arith.addf %39, %189 : vector<8x512xf32>
    %191 = vector.extract_strided_slice %190 {offsets = [0, 0], sizes = [8, 128], strides = [1, 1]} : vector<8x512xf32> to vector<8x128xf32>
    %192 = arith.negf %191 : vector<8x128xf32>
    %193 = math.exp %192 : vector<8x128xf32>
    %cst_35 = arith.constant 1.000000e+00 : f32
    %194 = vector.broadcast %cst_35 : f32 to vector<8x128xf32>
    %195 = arith.addf %194, %193 : vector<8x128xf32>
    %196 = arith.divf %194, %195 : vector<8x128xf32>
    %197 = vector.extract_strided_slice %190 {offsets = [0, 128], sizes = [8, 128], strides = [1, 1]} : vector<8x512xf32> to vector<8x128xf32>
    %198 = arith.negf %197 : vector<8x128xf32>
    %199 = math.exp %198 : vector<8x128xf32>
    %cst_36 = arith.constant 1.000000e+00 : f32
    %200 = vector.broadcast %cst_36 : f32 to vector<8x128xf32>
    %201 = arith.addf %200, %199 : vector<8x128xf32>
    %202 = arith.divf %200, %201 : vector<8x128xf32>
    %203 = vector.extract_strided_slice %190 {offsets = [0, 256], sizes = [8, 128], strides = [1, 1]} : vector<8x512xf32> to vector<8x128xf32>
    %204 = math.tanh %203 : vector<8x128xf32>
    %205 = vector.extract_strided_slice %190 {offsets = [0, 384], sizes = [8, 128], strides = [1, 1]} : vector<8x512xf32> to vector<8x128xf32>
    %206 = arith.negf %205 : vector<8x128xf32>
    %207 = math.exp %206 : vector<8x128xf32>
    %cst_37 = arith.constant 1.000000e+00 : f32
    %208 = vector.broadcast %cst_37 : f32 to vector<8x128xf32>
    %209 = arith.addf %208, %207 : vector<8x128xf32>
    %210 = arith.divf %208, %209 : vector<8x128xf32>
    %211 = arith.mulf %202, %186 : vector<8x128xf32>
    %212 = arith.mulf %196, %204 : vector<8x128xf32>
    %213 = arith.addf %211, %212 : vector<8x128xf32>
    %214 = math.tanh %213 : vector<8x128xf32>
    %215 = arith.mulf %210, %214 : vector<8x128xf32>
    %cst_38 = arith.constant dense<0.000000e+00> : vector<8x512xf32>
    %216 = tpu.matmul %215, %2, %cst_38 {dimension_numbers = #tpu.dot_dimension_numbers<[1], [0], [0], [1], [0, 0, 1, 1], [], []>} : vector<8x128xf32>, vector<128x512xf32>, vector<8x512xf32> -> vector<8x512xf32>
    %217 = arith.addf %45, %216 : vector<8x512xf32>
    %218 = vector.extract_strided_slice %217 {offsets = [0, 0], sizes = [8, 128], strides = [1, 1]} : vector<8x512xf32> to vector<8x128xf32>
    %219 = arith.negf %218 : vector<8x128xf32>
    %220 = math.exp %219 : vector<8x128xf32>
    %cst_39 = arith.constant 1.000000e+00 : f32
    %221 = vector.broadcast %cst_39 : f32 to vector<8x128xf32>
    %222 = arith.addf %221, %220 : vector<8x128xf32>
    %223 = arith.divf %221, %222 : vector<8x128xf32>
    %224 = vector.extract_strided_slice %217 {offsets = [0, 128], sizes = [8, 128], strides = [1, 1]} : vector<8x512xf32> to vector<8x128xf32>
    %225 = arith.negf %224 : vector<8x128xf32>
    %226 = math.exp %225 : vector<8x128xf32>
    %cst_40 = arith.constant 1.000000e+00 : f32
    %227 = vector.broadcast %cst_40 : f32 to vector<8x128xf32>
    %228 = arith.addf %227, %226 : vector<8x128xf32>
    %229 = arith.divf %227, %228 : vector<8x128xf32>
    %230 = vector.extract_strided_slice %217 {offsets = [0, 256], sizes = [8, 128], strides = [1, 1]} : vector<8x512xf32> to vector<8x128xf32>
    %231 = math.tanh %230 : vector<8x128xf32>
    %232 = vector.extract_strided_slice %217 {offsets = [0, 384], sizes = [8, 128], strides = [1, 1]} : vector<8x512xf32> to vector<8x128xf32>
    %233 = arith.negf %232 : vector<8x128xf32>
    %234 = math.exp %233 : vector<8x128xf32>
    %cst_41 = arith.constant 1.000000e+00 : f32
    %235 = vector.broadcast %cst_41 : f32 to vector<8x128xf32>
    %236 = arith.addf %235, %234 : vector<8x128xf32>
    %237 = arith.divf %235, %236 : vector<8x128xf32>
    %238 = arith.mulf %229, %213 : vector<8x128xf32>
    %239 = arith.mulf %223, %231 : vector<8x128xf32>
    %240 = arith.addf %238, %239 : vector<8x128xf32>
    %241 = math.tanh %240 : vector<8x128xf32>
    %242 = arith.mulf %237, %241 : vector<8x128xf32>
    %cst_42 = arith.constant dense<0.000000e+00> : vector<8x512xf32>
    %243 = tpu.matmul %242, %2, %cst_42 {dimension_numbers = #tpu.dot_dimension_numbers<[1], [0], [0], [1], [0, 0, 1, 1], [], []>} : vector<8x128xf32>, vector<128x512xf32>, vector<8x512xf32> -> vector<8x512xf32>
    %244 = arith.addf %51, %243 : vector<8x512xf32>
    %245 = vector.extract_strided_slice %244 {offsets = [0, 0], sizes = [8, 128], strides = [1, 1]} : vector<8x512xf32> to vector<8x128xf32>
    %246 = arith.negf %245 : vector<8x128xf32>
    %247 = math.exp %246 : vector<8x128xf32>
    %cst_43 = arith.constant 1.000000e+00 : f32
    %248 = vector.broadcast %cst_43 : f32 to vector<8x128xf32>
    %249 = arith.addf %248, %247 : vector<8x128xf32>
    %250 = arith.divf %248, %249 : vector<8x128xf32>
    %251 = vector.extract_strided_slice %244 {offsets = [0, 128], sizes = [8, 128], strides = [1, 1]} : vector<8x512xf32> to vector<8x128xf32>
    %252 = arith.negf %251 : vector<8x128xf32>
    %253 = math.exp %252 : vector<8x128xf32>
    %cst_44 = arith.constant 1.000000e+00 : f32
    %254 = vector.broadcast %cst_44 : f32 to vector<8x128xf32>
    %255 = arith.addf %254, %253 : vector<8x128xf32>
    %256 = arith.divf %254, %255 : vector<8x128xf32>
    %257 = vector.extract_strided_slice %244 {offsets = [0, 256], sizes = [8, 128], strides = [1, 1]} : vector<8x512xf32> to vector<8x128xf32>
    %258 = math.tanh %257 : vector<8x128xf32>
    %259 = vector.extract_strided_slice %244 {offsets = [0, 384], sizes = [8, 128], strides = [1, 1]} : vector<8x512xf32> to vector<8x128xf32>
    %260 = arith.negf %259 : vector<8x128xf32>
    %261 = math.exp %260 : vector<8x128xf32>
    %cst_45 = arith.constant 1.000000e+00 : f32
    %262 = vector.broadcast %cst_45 : f32 to vector<8x128xf32>
    %263 = arith.addf %262, %261 : vector<8x128xf32>
    %264 = arith.divf %262, %263 : vector<8x128xf32>
    %265 = arith.mulf %256, %240 : vector<8x128xf32>
    %266 = arith.mulf %250, %258 : vector<8x128xf32>
    %267 = arith.addf %265, %266 : vector<8x128xf32>
    %268 = math.tanh %267 : vector<8x128xf32>
    %269 = arith.mulf %264, %268 : vector<8x128xf32>
    %c0_46 = arith.constant 0 : index
    %c0_47 = arith.constant 0 : index
    %270 = vector.load %arg3[%c0_46, %c0_47] : memref<128x128xf32, #tpu.memory_space<vmem>>, vector<128x128xf32>
    %cst_48 = arith.constant dense<0.000000e+00> : vector<8x128xf32>
    %271 = tpu.matmul %269, %270, %cst_48 {dimension_numbers = #tpu.dot_dimension_numbers<[1], [0], [0], [1], [0, 0, 1, 1], [], []>} : vector<8x128xf32>, vector<128x128xf32>, vector<8x128xf32> -> vector<8x128xf32>
    %c0_49 = arith.constant 0 : index
    %c0_50 = arith.constant 0 : index
    %272 = vector.load %arg4[%c0_49, %c0_50] : memref<1x128xf32, #tpu.memory_space<vmem>>, vector<1x128xf32>
    %273 = vector.broadcast %272 : vector<1x128xf32> to vector<8x128xf32>
    %274 = arith.addf %271, %273 : vector<8x128xf32>
    %c0_51 = arith.constant 0 : index
    %c0_52 = arith.constant 0 : index
    %275 = vector.load %arg5[%c0_51, %c0_52] : memref<8x128xf32, #tpu.memory_space<vmem>>, vector<8x128xf32>
    tpu.vector_store %arg5[%c0_51, %c0_52], %274 {strides = array<i32>} : memref<8x128xf32, #tpu.memory_space<vmem>>, vector<8x128xf32>,
    return
  }
}

</mosaic_0001>

<bundles_post_ra>
// kernel: tpu_custom_call.1
= control target key start
LH: loop header
LB: loop body
LE: loop exit
PB: predicated region body
PF: predicated region fallthrough
CT: control target
= control target key end

     0   :  { %10 = vsyncpa [#allocation3], 0  ;;  %s5147_s0 = inlined_call_operand.hbm [shape: s32[8,8], index: 0, kind: input, shape index: {}]   ;;  %s5148_s1 = inlined_call_operand.hbm [shape: f32[128,512], index: 1, kind: input, shape index: {}]   ;;  %s5149_s2 = inlined_call_operand.hbm [shape: f32[128,512], index: 2, kind: input, shape index: {}]   ;;  %s5150_s3 = inlined_call_operand.hbm [shape: f32[128,128], index: 3, kind: input, shape index: {}]   ;;  %s5151_s4 = inlined_call_operand.vmem [shape: f32[1,128], index: 4, kind: input, shape index: {}]   ;;  %s5152_s5 = inlined_call_operand.hbm [shape: f32[8,128], index: 5, kind: output, shape index: {}]  }
   0x1   :  { %11 = vsyncpa [#allocation6], 0 }
   0x2   :  { %12 = vsyncpa [#allocation9], 0 }
   0x3   :  { %13 = vsyncpa [#allocation4], 0  ;;  %s4286_s18 = smov [#allocation5]   ;;  %s4168_s22 = scalar_lea.hbm %s5148_s1, 8192 }
   0x4   :  { %s29_s19 = sshll.u32 %s4286_s18, 4  ;;  %p4169_p0 = scmp.ne.s32.totalorder %s5148_s1, %s4168_s22  ;;  %s30_s19 = int_to_ptr.vmem [resolvable:$true] %s29_s19 }
   0x5   :  { %p4172_p1 = scmp.lt.u32.totalorder %s4168_s22, %s5148_s1 }
   0x7   :  { %p4174_p2 = pnand %p4172_p1, %p4169_p0 }
   0x9   :  { %4177 = shalt.err (!%p4174_p2)
}
   0xa   :  { %s4178_s27 = scalar_lea.vmem %s30_s19, 8192  ;;  %p4183_p4 = scmp.lt.s32.totalorder %s30_s19, %s30_s19 }
   0xb   :  { %p4179_p3 = scmp.ne.s32.totalorder %s30_s19, %s4178_s27  ;;  %p4184_p5 = scmp.lt.s32.totalorder %s4178_s27, %s4178_s27 }
   0xd   :  { %p4185_p6 = por %p4184_p5, %p4183_p4 }
   0xf   :  { %p4186_p7 = pnand %p4185_p6, %p4179_p3 }
  0x11   :  { %4189 = shalt.err (!%p4186_p7)
}
  0x12   :  { %s4287_s28 = smov 512   ;;  %s4288_s29 = smov 32  }
  0x13   :  { %35 = dma.hbm_to_vmem [thread:$0]  %s5148_s1, 8192, %s30_s19, [#allocation6], %s4287_s28, %s4287_s28, %s4288_s29  }
  0x14   :  { %s4289_s7 = smov [#allocation2]   ;;  %s4290_s9 = smov [#allocation7]  }
  0x15   :  { %s20_s8 = sshll.u32 %s4289_s7, 4  ;;  %s41_s10 = sshll.u32 %s4290_s9, 4  ;;  %s21_s8 = int_to_ptr.vmem [resolvable:$true] %s20_s8  ;;  %s42_s10 = int_to_ptr.vmem [resolvable:$true] %s41_s10 }
  0x16   :  { %s4190_s13 = scalar_lea.hbm %s5147_s0, 128 }
  0x17   :  { %p4191_p8 = scmp.ne.s32.totalorder %s5147_s0, %s4190_s13  ;;  %p4194_p9 = scmp.lt.u32.totalorder %s4190_s13, %s5147_s0 }
  0x19   :  { %p4196_p10 = pnand %p4194_p9, %p4191_p8 }
  0x1b   :  { %4199 = shalt.err (!%p4196_p10)
}
  0x1c   :  { %s4200_s1 = scalar_lea.vmem %s21_s8, 128  ;;  %p4205_p12 = scmp.lt.s32.totalorder %s21_s8, %s21_s8 }
  0x1d   :  { %p4201_p11 = scmp.ne.s32.totalorder %s21_s8, %s4200_s1  ;;  %p4206_p13 = scmp.lt.s32.totalorder %s4200_s1, %s4200_s1 }
  0x1f   :  { %p4207_p0 = por %p4206_p13, %p4205_p12 }
  0x21   :  { %p4208_p1 = pnand %p4207_p0, %p4201_p11 }
  0x23   :  { %4211 = shalt.err (!%p4208_p1)
}
  0x24   :  { %23 = dma.hbm_to_vmem [thread:$0]  %s5147_s0, 128, %s21_s8, [#allocation3]  }
  0x25   :  { %s4212_s22 = scalar_lea.hbm %s5149_s2, 8192 }
  0x26   :  { %p4213_p2 = scmp.ne.s32.totalorder %s5149_s2, %s4212_s22  ;;  %p4216_p3 = scmp.lt.u32.totalorder %s4212_s22, %s5149_s2 }
  0x28   :  { %p4218_p4 = pnand %p4216_p3, %p4213_p2 }
  0x2a   :  { %4221 = shalt.err (!%p4218_p4)
}
  0x2b   :  { %s4222_s27 = scalar_lea.vmem %s42_s10, 8192  ;;  %p4227_p6 = scmp.lt.s32.totalorder %s42_s10, %s42_s10 }
  0x2c   :  { %p4223_p5 = scmp.ne.s32.totalorder %s42_s10, %s4222_s27  ;;  %p4228_p7 = scmp.lt.s32.totalorder %s4222_s27, %s4222_s27 }
  0x2e   :  { %p4229_p8 = por %p4228_p7, %p4227_p6 }
  0x30   :  { %p4230_p9 = pnand %p4229_p8, %p4223_p5 }
  0x32   :  { %4233 = shalt.err (!%p4230_p9)
}
  0x33   :  { %47 = dma.hbm_to_vmem [thread:$0]  %s5149_s2, 8192, %s42_s10, [#allocation6], %s4287_s28, %s4287_s28, %s4288_s29  }
  0x34   :  { %s4291_s6 = smov [#allocation8]   ;;  %s4234_s11 = scalar_lea.hbm %s5150_s3, 2048 }
  0x35   :  { %s53_s7 = sshll.u32 %s4291_s6, 4  ;;  %p4235_p10 = scmp.ne.s32.totalorder %s5150_s3, %s4234_s11  ;;  %s54_s7 = int_to_ptr.vmem [resolvable:$true] %s53_s7 }
  0x36   :  { %p4238_p11 = scmp.lt.u32.totalorder %s4234_s11, %s5150_s3 }
  0x38   :  { %p4240_p12 = pnand %p4238_p11, %p4235_p10 }
  0x3a   :  { %4243 = shalt.err (!%p4240_p12)
}
  0x3b   :  { %s4244_s16 = scalar_lea.vmem %s54_s7, 2048  ;;  %p4249_p0 = scmp.lt.s32.totalorder %s54_s7, %s54_s7 }
  0x3c   :  { %p4245_p13 = scmp.ne.s32.totalorder %s54_s7, %s4244_s16  ;;  %p4250_p1 = scmp.lt.s32.totalorder %s4244_s16, %s4244_s16 }
  0x3e   :  { %p4251_p2 = por %p4250_p1, %p4249_p0 }
  0x40   :  { %p4252_p3 = pnand %p4251_p2, %p4245_p13 }
  0x42   :  { %4255 = shalt.err (!%p4252_p3)
}
  0x43   :  { %s4292_s2 = smov 128   ;;  %s4293_s28 = smov 8  }
  0x44   :  { %59 = dma.hbm_to_vmem [thread:$0]  %s5150_s3, 2048, %s54_s7, [#allocation9], %s4292_s2, %s4292_s2, %s4293_s28  }
  0x45   :  { %4278 = dma.done.wait [#allocation3], 128  }
  0x46   :  { %4279 = vsyncadd [#allocation3], 4294967168 }
  0x47   :  { %4280 = dma.done.wait [#allocation6], 16384  }
  0x48   :  { %4281 = vsyncadd [#allocation6], 4294950912 }
  0x49   :  { %4282 = dma.done.wait [#allocation9], 2048  }
  0x4a   :  { %4283 = vsyncadd [#allocation9], 4294965248  ;;  %v4294_v0 = vmov 0   ;;  %v5153_v1 = vmov 0.0   ;;  %v4393_v2 = vld [vmem:[#allocation2] sm:$0xff]  ;;  %v140_v3 = vld [vmem:[#allocation7 + $0x8] sm:$0xff] }
  0x4b   :  { %4030 = vset.pattern.permute.xlu0 %v4294_v0  ;;  %317 = vmatprep.mubr.f32.mxu0 %v5153_v1  ;;  %5224 = vst [vmem:[#allocation15_spill] sm:$0xff] %v4393_v2  ;;  %v144_v4 = vld [vmem:[#allocation7 + $0x28] sm:$0xff]  ;;  %v142_v6 = vld [vmem:[#allocation7 + $0x18] sm:$0xff]  ;;  %v139_v8 = vld [vmem:[#allocation7] sm:$0xff]  ;;  %v4296_v31 = vmov 1   ;;  %vm4305_vm8 = vmmov 0  }
  0x4c   :  { %388 = vmatprep.mubr.f32.mxu1 %v5153_v1  ;;  %206 = vperm.xlu0 %4030, %v4393_v2   ;;  %v4396_v5 = vpack.c.bf16 %v144_v4, %v140_v3  ;;  %v146_v7 = vld [vmem:[#allocation7 + $0x38] sm:$0xff]  ;;  %v143_v10 = vld [vmem:[#allocation7 + $0x20] sm:$0xff]  ;;  %v141_v11 = vld [vmem:[#allocation7 + $0x10] sm:$0xff]  ;;  %s4306_s1 = smov [#allocation10]  }
  0x4d   :  { %v4398_v9 = vpack.c.bf16 %v146_v7, %v142_v6  ;;  %v145_v12 = vld [vmem:[#allocation7 + $0x30] sm:$0xff]  ;;  %v4401_v13 = vpack.c.bf16 %v143_v10, %v139_v8  ;;  %v148_v15 = vld [vmem:[#allocation7 + $0x48] sm:$0xff]  ;;  %v150_v17 = vld [vmem:[#allocation7 + $0x58] sm:$0xff]  ;;  %s2817_s18 = sshll.u32 %s4306_s1, 4  ;;  %s2818_s18 = int_to_ptr.vmem [resolvable:$true] %s2817_s18 }
  0x4e   :  { %2930 = vmatprep.subr.bf16.mxu0 %v4396_v5  ;;  %v4403_v14 = vpack.c.bf16 %v145_v12, %v141_v11  ;;  %v152_v16 = vld [vmem:[#allocation7 + $0x68] sm:$0xff]  ;;  %v154_v19 = vld [vmem:[#allocation7 + $0x78] sm:$0xff]  ;;  %v147_v20 = vld [vmem:[#allocation7 + $0x40] sm:$0xff]  ;;  %s4256_s19 = scalar_lea.vmem %s2818_s18, 128  ;;  %p4261_p5 = scmp.lt.s32.totalorder %s2818_s18, %s2818_s18 }
  0x4f   :  { %2962 = vmatprep.subr.bf16.mxu1 %v4398_v9  ;;  %v4406_v18 = vpack.c.bf16 %v152_v16, %v148_v15  ;;  %v151_v21 = vld [vmem:[#allocation7 + $0x60] sm:$0xff]  ;;  %2932 = vmatpush1.bf16.msra.mxu0 %v4401_v13  ;;  %v4410_v22 = vpack.c.bf16 %v154_v19, %v150_v17  ;;  %v149_v24 = vld [vmem:[#allocation7 + $0x50] sm:$0xff]  ;;  %v156_v26 = vld [vmem:[#allocation7 + $0x88] sm:$0xff]  ;;  %p4257_p4 = scmp.ne.s32.totalorder %s2818_s18, %s4256_s19  ;;  %p4262_p6 = scmp.lt.s32.totalorder %s4256_s19, %s4256_s19 }
  0x50   :  { %2964 = vmatpush1.bf16.msra.mxu1 %v4403_v14  ;;  %v4412_v23 = vpack.c.bf16 %v151_v21, %v147_v20  ;;  %v153_v25 = vld [vmem:[#allocation7 + $0x70] sm:$0xff]  ;;  %v160_v28 = vld [vmem:[#allocation7 + $0xa8] sm:$0xff]  ;;  %v158_v29 = vld [vmem:[#allocation7 + $0x98] sm:$0xff]  ;;  %4031 = vset.pattern.permute.xlu0 %v4296_v31 }
  0x51   :  { %2934 = vmatprep.subr.bf16.mxu0 %v4406_v18  ;;  %v4415_v27 = vpack.c.bf16 %v153_v25, %v149_v24  ;;  %v162_v30 = vld [vmem:[#allocation7 + $0xb8] sm:$0xff]  ;;  %2966 = vmatprep.subr.bf16.mxu1 %v4410_v22  ;;  %v4418_v32 = vpack.c.bf16 %v160_v28, %v156_v26  ;;  %v155_v34 = vld [vmem:[#allocation7 + $0x80] sm:$0xff]  ;;  %v157_v36 = vld [vmem:[#allocation7 + $0x90] sm:$0xff]  ;;  %p4263_p7 = por %p4262_p6, %p4261_p5 }
  0x52   :  { %v4420_v33 = vpack.c.bf16 %v162_v30, %v158_v29  ;;  %v159_v35 = vld [vmem:[#allocation7 + $0xa0] sm:$0xff]  ;;  %212 = vperm.xlu0 %4031, %v4393_v2   ;;  %v161_v37 = vld [vmem:[#allocation7 + $0xb0] sm:$0xff]  ;;  %v164_v38 = vld [vmem:[#allocation7 + $0xc8] sm:$0xff] }
  0x53   :  { %v168_v39 = vld [vmem:[#allocation7 + $0xe8] sm:$0xff]  ;;  %2936 = vmatpush1.bf16.msra.mxu0 %v4412_v23  ;;  %v4425_v40 = vpack.c.bf16 %v159_v35, %v155_v34  ;;  %v4427_v41 = vpack.c.bf16 %v161_v37, %v157_v36  ;;  %v166_v42 = vld [vmem:[#allocation7 + $0xd8] sm:$0xff]  ;;  %v163_v44 = vld [vmem:[#allocation7 + $0xc0] sm:$0xff]  ;;  %p4264_p8 = pnand %p4263_p7, %p4257_p4 }
  0x54   :  { %2968 = vmatpush1.bf16.msra.mxu1 %v4415_v27  ;;  %v170_v43 = vld [vmem:[#allocation7 + $0xf8] sm:$0xff]  ;;  %2938 = vmatprep.subr.bf16.mxu0 %v4418_v32  ;;  %v4431_v45 = vpack.c.bf16 %v168_v39, %v164_v38  ;;  %v167_v47 = vld [vmem:[#allocation7 + $0xe0] sm:$0xff]  ;;  %v165_v48 = vld [vmem:[#allocation7 + $0xd0] sm:$0xff] }
  0x55   :  { %2970 = vmatprep.subr.bf16.mxu1 %v4420_v33  ;;  %v4433_v46 = vpack.c.bf16 %v170_v43, %v166_v42  ;;  %v169_v49 = vld [vmem:[#allocation7 + $0xf0] sm:$0xff]  ;;  %v172_v50 = vld [vmem:[#allocation7 + $0x108] sm:$0xff]  ;;  %v174_v52 = vld [vmem:[#allocation7 + $0x118] sm:$0xff]  ;;  %v4437_v54 = vpack.c.bf16 %v167_v47, %v163_v44 }
  0x56   :  { %v176_v51 = vld [vmem:[#allocation7 + $0x128] sm:$0xff]  ;;  %v178_v53 = vld [vmem:[#allocation7 + $0x138] sm:$0xff]  ;;  %v4439_v55 = vpack.c.bf16 %v169_v49, %v165_v48  ;;  %v171_v56 = vld [vmem:[#allocation7 + $0x100] sm:$0xff] }
  0x57   :  { %5225 = vst [vmem:[#allocation16_spill] sm:$0xff] %v4433_v46  ;;  %2940 = vmatpush1.bf16.msra.mxu0 %v4425_v40  ;;  %5226 = vst [vmem:[#allocation17_spill] sm:$0xff] %v4437_v54  ;;  %v175_v57 = vld [vmem:[#allocation7 + $0x120] sm:$0xff]  ;;  %v4443_v58 = vpack.c.bf16 %v176_v51, %v172_v50  ;;  %v4445_v59 = vpack.c.bf16 %v178_v53, %v174_v52  ;;  %v173_v60 = vld [vmem:[#allocation7 + $0x110] sm:$0xff] }
  0x58   :  { %2972 = vmatpush1.bf16.msra.mxu1 %v4427_v41  ;;  %5227 = vst [vmem:[#allocation18_spill] sm:$0xff] %v4439_v55  ;;  %2942 = vmatprep.subr.bf16.mxu0 %v4431_v45  ;;  %v177_v61 = vld [vmem:[#allocation7 + $0x130] sm:$0xff]  ;;  %v180_v62 = vld [vmem:[#allocation7 + $0x148] sm:$0xff]  ;;  %v182_v0 = vld [vmem:[#allocation7 + $0x158] sm:$0xff]  ;;  %v4449_v4 = vpack.c.bf16 %v175_v57, %v171_v56 }
  0x59   :  { %2974 = vmatprep.subr.bf16.mxu1 %v4433_v46  ;;  %5228 = vst [vmem:[#allocation19_spill] sm:$0xff] %v4443_v58  ;;  %5229 = vst [vmem:[#allocation20_spill] sm:$0xff] %v4445_v59  ;;  %v184_v63 = vld [vmem:[#allocation7 + $0x168] sm:$0xff]  ;;  %v186_v3 = vld [vmem:[#allocation7 + $0x178] sm:$0xff]  ;;  %v4451_v6 = vpack.c.bf16 %v177_v61, %v173_v60 }
  0x5a   :  { %5230 = vst [vmem:[#allocation21_spill] sm:$0xff] %v4449_v4  ;;  %v179_v7 = vld [vmem:[#allocation7 + $0x140] sm:$0xff]  ;;  %v4455_v10 = vpack.c.bf16 %v184_v63, %v180_v62  ;;  %v4457_v11 = vpack.c.bf16 %v186_v3, %v182_v0  ;;  %v181_v12 = vld [vmem:[#allocation7 + $0x150] sm:$0xff]  ;;  %v188_v16 = vld [vmem:[#allocation7 + $0x188] sm:$0xff] }
  0x5b   :  { %2944 = vmatpush1.bf16.msra.mxu0 %v4437_v54  ;;  %5231 = vst [vmem:[#allocation22_spill] sm:$0xff] %v4451_v6  ;;  %v183_v8 = vld [vmem:[#allocation7 + $0x160] sm:$0xff]  ;;  %v185_v15 = vld [vmem:[#allocation7 + $0x170] sm:$0xff]  ;;  %v192_v17 = vld [vmem:[#allocation7 + $0x1a8] sm:$0xff] }
  0x5c   :  { %2976 = vmatpush1.bf16.msra.mxu1 %v4439_v55  ;;  %2946 = vmatprep.subr.bf16.mxu0 %v4443_v58  ;;  %5232 = vst [vmem:[#allocation23_spill] sm:$0xff] %v4455_v10  ;;  %5233 = vst [vmem:[#allocation24_spill] sm:$0xff] %v4457_v11  ;;  %v190_v19 = vld [vmem:[#allocation7 + $0x198] sm:$0xff]  ;;  %v4461_v21 = vpack.c.bf16 %v183_v8, %v179_v7  ;;  %v4463_v24 = vpack.c.bf16 %v185_v15, %v181_v12  ;;  %v187_v25 = vld [vmem:[#allocation7 + $0x180] sm:$0xff] }
  0x5d   :  { %2978 = vmatprep.subr.bf16.mxu1 %v4445_v59  ;;  %v194_v20 = vld [vmem:[#allocation7 + $0x1b8] sm:$0xff]  ;;  %v191_v26 = vld [vmem:[#allocation7 + $0x1a0] sm:$0xff]  ;;  %v4467_v28 = vpack.c.bf16 %v192_v17, %v188_v16  ;;  %v189_v30 = vld [vmem:[#allocation7 + $0x190] sm:$0xff] }
  0x5e   :  { %5234 = vst [vmem:[#allocation25_spill] sm:$0xff] %v4461_v21  ;;  %5235 = vst [vmem:[#allocation26_spill] sm:$0xff] %v4463_v24  ;;  %v4469_v29 = vpack.c.bf16 %v194_v20, %v190_v19  ;;  %v193_v31 = vld [vmem:[#allocation7 + $0x1b0] sm:$0xff]  ;;  %v196_v34 = vld [vmem:[#allocation7 + $0x1c8] sm:$0xff]  ;;  %v4473_v38 = vpack.c.bf16 %v191_v26, %v187_v25 }
  0x5f   :  { %2948 = vmatpush1.bf16.msra.mxu0 %v4449_v4  ;;  %5236 = vst [vmem:[#allocation27_spill] sm:$0xff] %v4467_v28  ;;  %v200_v35 = vld [vmem:[#allocation7 + $0x1e8] sm:$0xff]  ;;  %v198_v36 = vld [vmem:[#allocation7 + $0x1d8] sm:$0xff]  ;;  %v4475_v39 = vpack.c.bf16 %v193_v31, %v189_v30  ;;  %v195_v42 = vld [vmem:[#allocation7 + $0x1c0] sm:$0xff] }
  0x60   :  { %2980 = vmatpush1.bf16.msra.mxu1 %v4451_v6  ;;  %2950 = vmatprep.subr.bf16.mxu0 %v4455_v10  ;;  %5237 = vst [vmem:[#allocation28_spill] sm:$0xff] %v4469_v29  ;;  %v202_v37 = vld [vmem:[#allocation7 + $0x1f8] sm:$0xff]  ;;  %5238 = vst [vmem:[#allocation29_spill] sm:$0xff] %v4473_v38  ;;  %v199_v43 = vld [vmem:[#allocation7 + $0x1e0] sm:$0xff]  ;;  %v4479_v44 = vpack.c.bf16 %v200_v35, %v196_v34 }
  0x61   :  { %2982 = vmatprep.subr.bf16.mxu1 %v4457_v11  ;;  %5239 = vst [vmem:[#allocation30_spill] sm:$0xff] %v4475_v39  ;;  %v4481_v47 = vpack.c.bf16 %v202_v37, %v198_v36  ;;  %v197_v48 = vld [vmem:[#allocation7 + $0x1d0] sm:$0xff]  ;;  %v76_v50 = vld [vmem:[#allocation5 + $0x8] sm:$0xff]  ;;  %v78_v52 = vld [vmem:[#allocation5 + $0x18] sm:$0xff]  ;;  %v4485_v56 = vpack.c.bf16 %v199_v43, %v195_v42 }
  0x62   :  { %5240 = vst [vmem:[#allocation31_spill] sm:$0xff] %v4479_v44  ;;  %v201_v49 = vld [vmem:[#allocation7 + $0x1f0] sm:$0xff]  ;;  %v80_v51 = vld [vmem:[#allocation5 + $0x28] sm:$0xff]  ;;  %v82_v53 = vld [vmem:[#allocation5 + $0x38] sm:$0xff] }
  0x63   :  { %2952 = vmatpush1.bf16.msra.mxu0 %v4461_v21  ;;  %5241 = vst [vmem:[#allocation32_spill] sm:$0xff] %v4481_v47  ;;  %5242 = vst [vmem:[#allocation33_spill] sm:$0xff] %v4485_v56  ;;  %v4487_v57 = vpack.c.bf16 %v201_v49, %v197_v48  ;;  %v75_v60 = vld [vmem:[#allocation5] sm:$0xff]  ;;  %v4491_v62 = vpack.c.bf16 %v80_v51, %v76_v50  ;;  %v4493_v63 = vpack.c.bf16 %v82_v53, %v78_v52  ;;  %v77_v0 = vld [vmem:[#allocation5 + $0x10] sm:$0xff] }
  0x64   :  { %2984 = vmatpush1.bf16.msra.mxu1 %v4463_v24  ;;  %2954 = vmatprep.subr.bf16.mxu0 %v4467_v28  ;;  %v79_v61 = vld [vmem:[#allocation5 + $0x20] sm:$0xff]  ;;  %v81_v3 = vld [vmem:[#allocation5 + $0x30] sm:$0xff]  ;;  %v84_v7 = vld [vmem:[#allocation5 + $0x48] sm:$0xff] }
  0x65   :  { %2986 = vmatprep.subr.bf16.mxu1 %v4469_v29  ;;  %5243 = vst [vmem:[#allocation34_spill] sm:$0xff] %v4487_v57  ;;  %5244 = vst [vmem:[#allocation35_spill] sm:$0xff] %v4491_v62  ;;  %v88_v8 = vld [vmem:[#allocation5 + $0x68] sm:$0xff]  ;;  %v86_v12 = vld [vmem:[#allocation5 + $0x58] sm:$0xff]  ;;  %v4497_v16 = vpack.c.bf16 %v79_v61, %v75_v60  ;;  %v4499_v17 = vpack.c.bf16 %v81_v3, %v77_v0 }
  0x66   :  { %5245 = vst [vmem:[#allocation36_spill] sm:$0xff] %v4493_v63  ;;  %v90_v15 = vld [vmem:[#allocation5 + $0x78] sm:$0xff]  ;;  %v83_v19 = vld [vmem:[#allocation5 + $0x40] sm:$0xff]  ;;  %v4503_v25 = vpack.c.bf16 %v88_v8, %v84_v7  ;;  %v85_v30 = vld [vmem:[#allocation5 + $0x50] sm:$0xff] }
  0x67   :  { %2956 = vmatpush1.bf16.msra.mxu0 %v4473_v38  ;;  %v87_v20 = vld [vmem:[#allocation5 + $0x60] sm:$0xff]  ;;  %v4505_v26 = vpack.c.bf16 %v90_v15, %v86_v12  ;;  %v89_v31 = vld [vmem:[#allocation5 + $0x70] sm:$0xff]  ;;  %v92_v34 = vld [vmem:[#allocation5 + $0x88] sm:$0xff] }
  0x68   :  { %2988 = vmatpush1.bf16.msra.mxu1 %v4475_v39  ;;  %2958 = vmatprep.subr.bf16.mxu0 %v4479_v44  ;;  %v96_v35 = vld [vmem:[#allocation5 + $0xa8] sm:$0xff]  ;;  %v94_v36 = vld [vmem:[#allocation5 + $0x98] sm:$0xff]  ;;  %v4511_v42 = vpack.c.bf16 %v87_v20, %v83_v19  ;;  %v4513_v43 = vpack.c.bf16 %v89_v31, %v85_v30  ;;  %v91_v48 = vld [vmem:[#allocation5 + $0x80] sm:$0xff] }
  0x69   :  { %2990 = vmatprep.subr.bf16.mxu1 %v4481_v47  ;;  %v98_v37 = vld [vmem:[#allocation5 + $0xb8] sm:$0xff]  ;;  %v95_v49 = vld [vmem:[#allocation5 + $0xa0] sm:$0xff]  ;;  %v4517_v50 = vpack.c.bf16 %v96_v35, %v92_v34  ;;  %v93_v52 = vld [vmem:[#allocation5 + $0x90] sm:$0xff] }
  0x6a   :  { %v4519_v51 = vpack.c.bf16 %v98_v37, %v94_v36  ;;  %v97_v53 = vld [vmem:[#allocation5 + $0xb0] sm:$0xff]  ;;  %v100_v60 = vld [vmem:[#allocation5 + $0xc8] sm:$0xff]  ;;  %v102_v0 = vld [vmem:[#allocation5 + $0xd8] sm:$0xff]  ;;  %v4525_v7 = vpack.c.bf16 %v95_v49, %v91_v48 }
  0x6b   :  { %2960 = vmatpush1.bf16.msra.mxu0 %v4485_v56  ;;  %v104_v61 = vld [vmem:[#allocation5 + $0xe8] sm:$0xff]  ;;  %v106_v3 = vld [vmem:[#allocation5 + $0xf8] sm:$0xff]  ;;  %v4527_v8 = vpack.c.bf16 %v97_v53, %v93_v52  ;;  %v99_v12 = vld [vmem:[#allocation5 + $0xc0] sm:$0xff] }
  0x6c   :  { %2992 = vmatpush1.bf16.msra.mxu1 %v4487_v57  ;;  %2994 = vmatprep.subr.bf16.mxu0 %v4491_v62  ;;  %5246 = vst [vmem:[#allocation37_spill] sm:$0xff] %v4519_v51  ;;  %5247 = vst [vmem:[#allocation38_spill] sm:$0xff] %v4525_v7  ;;  %v103_v15 = vld [vmem:[#allocation5 + $0xe0] sm:$0xff]  ;;  %v4531_v19 = vpack.c.bf16 %v104_v61, %v100_v60  ;;  %v4533_v20 = vpack.c.bf16 %v106_v3, %v102_v0  ;;  %v101_v30 = vld [vmem:[#allocation5 + $0xd0] sm:$0xff] }
  0x6d   :  { %3026 = vmatprep.subr.bf16.mxu1 %v4493_v63  ;;  %5248 = vst [vmem:[#allocation39_spill] sm:$0xff] %v4527_v8  ;;  %v105_v31 = vld [vmem:[#allocation5 + $0xf0] sm:$0xff]  ;;  %v108_v34 = vld [vmem:[#allocation5 + $0x108] sm:$0xff]  ;;  %v110_v36 = vld [vmem:[#allocation5 + $0x118] sm:$0xff]  ;;  %v4537_v48 = vpack.c.bf16 %v103_v15, %v99_v12 }
  0x6e   :  { %318 = vmatmul.mubr.f32.vlgmr.msra.gmra.mrb[0].mxu0 %v5153_v1  ;;  %5249 = vst [vmem:[#allocation40_spill] sm:$0xff] %v4531_v19  ;;  %5250 = vst [vmem:[#allocation41_spill] sm:$0xff] %v4533_v20  ;;  %v112_v35 = vld [vmem:[#allocation5 + $0x128] sm:$0xff]  ;;  %v114_v37 = vld [vmem:[#allocation5 + $0x138] sm:$0xff]  ;;  %v4539_v49 = vpack.c.bf16 %v105_v31, %v101_v30 }
  0x6f   :  { %389 = vmatmul.mubr.f32.vlgmr.msra.gmra.mrb[0].mxu1 %v5153_v1  ;;  %2996 = vmatpush1.bf16.msra.mxu0 %v4497_v16  ;;  %5251 = vst [vmem:[#allocation42_spill] sm:$0xff] %v4537_v48  ;;  %v107_v52 = vld [vmem:[#allocation5 + $0x100] sm:$0xff]  ;;  %v4543_v60 = vpack.c.bf16 %v112_v35, %v108_v34  ;;  %v4545_v61 = vpack.c.bf16 %v114_v37, %v110_v36  ;;  %v109_v0 = vld [vmem:[#allocation5 + $0x110] sm:$0xff] }
  0x70   :  { %3028 = vmatpush1.bf16.msra.mxu1 %v4499_v17  ;;  %2998 = vmatprep.subr.bf16.mxu0 %v4503_v25  ;;  %5252 = vst [vmem:[#allocation43_spill] sm:$0xff] %v4539_v49  ;;  %v111_v53 = vld [vmem:[#allocation5 + $0x120] sm:$0xff]  ;;  %v113_v3 = vld [vmem:[#allocation5 + $0x130] sm:$0xff] }
  0x71   :  { %3030 = vmatprep.subr.bf16.mxu1 %v4505_v26  ;;  %459 = vmatprep.mubr.f32.mxu0 %v5153_v1  ;;  %5253 = vst [vmem:[#allocation44_spill] sm:$0xff] %v4543_v60  ;;  %5254 = vst [vmem:[#allocation45_spill] sm:$0xff] %v4545_v61  ;;  %v4549_v12 = vpack.c.bf16 %v111_v53, %v107_v52  ;;  %v4551_v15 = vpack.c.bf16 %v113_v3, %v109_v0  ;;  %v115_v30 = vld [vmem:[#allocation5 + $0x140] sm:$0xff]  ;;  %v117_v36 = vld [vmem:[#allocation5 + $0x150] sm:$0xff] }
  0x72   :  { %530 = vmatprep.mubr.f32.mxu1 %v5153_v1  ;;  %v116_v1 = vld [vmem:[#allocation5 + $0x148] sm:$0xff]  ;;  %v119_v31 = vld [vmem:[#allocation5 + $0x160] sm:$0xff]  ;;  %v121_v37 = vld [vmem:[#allocation5 + $0x170] sm:$0xff] }
  0x73   :  { %3000 = vmatpush1.bf16.msra.mxu0 %v4511_v42  ;;  %5255 = vst [vmem:[#allocation46_spill] sm:$0xff] %v4549_v12  ;;  %5256 = vst [vmem:[#allocation47_spill] sm:$0xff] %v4551_v15  ;;  %v4561_v52 = vpack.c.bf16 %v119_v31, %v115_v30  ;;  %v4563_v53 = vpack.c.bf16 %v121_v37, %v117_v36  ;;  %v123_v0 = vld [vmem:[#allocation5 + $0x180] sm:$0xff]  ;;  %v137_v37 = vld [vmem:[#allocation5 + $0x1f0] sm:$0xff] }
  0x74   :  { %3032 = vmatpush1.bf16.msra.mxu1 %v4513_v43  ;;  %3002 = vmatprep.subr.bf16.mxu0 %v4517_v50  ;;  %v127_v3 = vld [vmem:[#allocation5 + $0x1a0] sm:$0xff] }
  0x75   :  { %3034 = vmatprep.subr.bf16.mxu1 %v4519_v51  ;;  %v118_v51 = vld [vmem:[#allocation5 + $0x158] sm:$0xff]  ;;  %v4573_v30 = vpack.c.bf16 %v127_v3, %v123_v0  ;;  %v131_v36 = vld [vmem:[#allocation5 + $0x1c0] sm:$0xff] }
  0x77   :  { %3004 = vmatpush1.bf16.msra.mxu0 %v4525_v7  ;;  %v120_v7 = vld [vmem:[#allocation5 + $0x168] sm:$0xff] }
  0x78   :  { %3036 = vmatpush1.bf16.msra.mxu1 %v4527_v8  ;;  %3006 = vmatprep.subr.bf16.mxu0 %v4531_v19  ;;  %v122_v8 = vld [vmem:[#allocation5 + $0x178] sm:$0xff]  ;;  %v4555_v34 = vpack.c.bf16 %v120_v7, %v116_v1  ;;  %v125_v7 = vld [vmem:[#allocation5 + $0x190] sm:$0xff] }
  0x79   :  { %3038 = vmatprep.subr.bf16.mxu1 %v4533_v20  ;;  %v4557_v35 = vpack.c.bf16 %v122_v8, %v118_v51  ;;  %v124_v20 = vld [vmem:[#allocation5 + $0x188] sm:$0xff]  ;;  %v126_v19 = vld [vmem:[#allocation5 + $0x198] sm:$0xff]  ;;  %v129_v8 = vld [vmem:[#allocation5 + $0x1b0] sm:$0xff] }
  0x7a   :  { %v4575_v31 = vpack.c.bf16 %v129_v8, %v125_v7  ;;  %v5257_v7 = vmov 0.0   ;;  %v4298_v8 = vmov 2  }
  0x7b   :  { %3008 = vmatpush1.bf16.msra.mxu0 %v4537_v48  ;;  %v128_v48 = vld [vmem:[#allocation5 + $0x1a8] sm:$0xff]  ;;  %4032 = vset.pattern.permute.xlu1 %v4298_v8 }
  0x7c   :  { %3040 = vmatpush1.bf16.msra.mxu1 %v4539_v49  ;;  %3010 = vmatprep.subr.bf16.mxu0 %v4543_v60  ;;  %v130_v49 = vld [vmem:[#allocation5 + $0x1b8] sm:$0xff]  ;;  %v4567_v1 = vpack.c.bf16 %v128_v48, %v124_v20  ;;  %v135_v48 = vld [vmem:[#allocation5 + $0x1e0] sm:$0xff] }
  0x7d   :  { %3042 = vmatprep.subr.bf16.mxu1 %v4545_v61  ;;  %v4569_v51 = vpack.c.bf16 %v130_v49, %v126_v19  ;;  %v132_v61 = vld [vmem:[#allocation5 + $0x1c8] sm:$0xff]  ;;  %v134_v60 = vld [vmem:[#allocation5 + $0x1d8] sm:$0xff]  ;;  %v133_v49 = vld [vmem:[#allocation5 + $0x1d0] sm:$0xff]  ;;  %v4585_v0 = vpack.c.bf16 %v135_v48, %v131_v36  ;;  %218 = vperm.xlu1 %4032, %v4393_v2  }
  0x7e   :  { %v4587_v3 = vpack.c.bf16 %v137_v37, %v133_v49 }
  0x7f   :  { %3012 = vmatpush1.bf16.msra.mxu0 %v4549_v12  ;;  %v136_v12 = vld [vmem:[#allocation5 + $0x1e8] sm:$0xff] }
  0x80   :  { %3044 = vmatpush1.bf16.msra.mxu1 %v4551_v15  ;;  %3014 = vmatprep.subr.bf16.mxu0 %v4555_v34  ;;  %v138_v15 = vld [vmem:[#allocation5 + $0x1f8] sm:$0xff]  ;;  %v4579_v19 = vpack.c.bf16 %v136_v12, %v132_v61 }
  0x81   :  { %3046 = vmatprep.subr.bf16.mxu1 %v4557_v35  ;;  %v4581_v20 = vpack.c.bf16 %v138_v15, %v134_v60  ;;  %v203_v60 = vlaneseq  ;;  %v5177_v15 = vmov 1.0  }
  0x83   :  { %3016 = vmatpush1.bf16.msra.mxu0 %v4561_v52  ;;  %v4595_v61 = vand.u32 127, %v203_v60 }
  0x84   :  { %3048 = vmatpush1.bf16.msra.mxu1 %v4563_v53  ;;  %3018 = vmatprep.subr.bf16.mxu0 %v4567_v1 }
  0x85   :  { %3050 = vmatprep.subr.bf16.mxu1 %v4569_v51 }
  0x87   :  { %3020 = vmatpush1.bf16.msra.mxu0 %v4573_v30 }
  0x88   :  { %3052 = vmatpush1.bf16.msra.mxu1 %v4575_v31  ;;  %3022 = vmatprep.subr.bf16.mxu0 %v4579_v19 }
  0x89   :  { %3054 = vmatprep.subr.bf16.mxu1 %v4581_v20 }
  0x8b   :  { %3024 = vmatpush1.bf16.msra.mxu0 %v4585_v0 }
  0x8c   :  { %3056 = vmatpush1.bf16.msra.mxu1 %v4587_v3  ;;  %3058 = vmatprep.subr.bf16.mxu0 %v4396_v5 }
  0x8d   :  { %3090 = vmatprep.subr.bf16.mxu1 %v4398_v9 }
  0xcb   :  { %v207_v12 = vpop.permute.xlu0 %206 }
  0xcc   :  { %vm208_vm0 = vcmp.eq.s32.totalorder %v207_v12, %v4595_v61 }
  0xcd   :  { %2836 = vmatmul.mubr.msk.f32.vlgmr.msra.gmra.mrb[0].mxu0 %vm208_vm0, %v5177_v15  ;;  %2837 = vmatmul.mubr.msk.f32.vlgmr.msra.gmra.mrb[0].mxu1 %vm208_vm0, %v5177_v15 }
  0xce   :  { %3060 = vmatpush1.bf16.msra.mxu0 %v4401_v13  ;;  %3092 = vmatpush1.bf16.msra.mxu1 %v4403_v14 }
  0xcf   :  { %3062 = vmatprep.subr.bf16.mxu0 %v4406_v18  ;;  %3094 = vmatprep.subr.bf16.mxu1 %v4410_v22 }
  0xd0   :  { %625 = vmatprep.mubr.f32.mxu0 %v5257_v7  ;;  %696 = vmatprep.mubr.f32.mxu1 %v5257_v7 }
  0xd2   :  { %3064 = vmatpush1.bf16.msra.mxu0 %v4412_v23  ;;  %3096 = vmatpush1.bf16.msra.mxu1 %v4415_v27 }
  0xd3   :  { %3066 = vmatprep.subr.bf16.mxu0 %v4418_v32  ;;  %3098 = vmatprep.subr.bf16.mxu1 %v4420_v33 }
  0xd6   :  { %3068 = vmatpush1.bf16.msra.mxu0 %v4425_v40  ;;  %3100 = vmatpush1.bf16.msra.mxu1 %v4427_v41 }
  0xd7   :  { %3070 = vmatprep.subr.bf16.mxu0 %v4431_v45  ;;  %3102 = vmatprep.subr.bf16.mxu1 %v4433_v46 }
  0xda   :  { %3072 = vmatpush1.bf16.msra.mxu0 %v4437_v54  ;;  %3104 = vmatpush1.bf16.msra.mxu1 %v4439_v55 }
  0xdb   :  { %3074 = vmatprep.subr.bf16.mxu0 %v4443_v58  ;;  %3106 = vmatprep.subr.bf16.mxu1 %v4445_v59 }
  0xde   :  { %3076 = vmatpush1.bf16.msra.mxu0 %v4449_v4  ;;  %3108 = vmatpush1.bf16.msra.mxu1 %v4451_v6 }
  0xdf   :  { %3078 = vmatprep.subr.bf16.mxu0 %v4455_v10  ;;  %3110 = vmatprep.subr.bf16.mxu1 %v4457_v11 }
  0xe2   :  { %3080 = vmatpush1.bf16.msra.mxu0 %v4461_v21  ;;  %3112 = vmatpush1.bf16.msra.mxu1 %v4463_v24 }
  0xe3   :  { %3082 = vmatprep.subr.bf16.mxu0 %v4467_v28  ;;  %3114 = vmatprep.subr.bf16.mxu1 %v4469_v29 }
  0xe6   :  { %3084 = vmatpush1.bf16.msra.mxu0 %v4473_v38  ;;  %3116 = vmatpush1.bf16.msra.mxu1 %v4475_v39 }
  0xe7   :  { %3086 = vmatprep.subr.bf16.mxu0 %v4479_v44  ;;  %3118 = vmatprep.subr.bf16.mxu1 %v4481_v47 }
  0xea   :  { %3088 = vmatpush1.bf16.msra.mxu0 %v4485_v56  ;;  %3120 = vmatpush1.bf16.msra.mxu1 %v4487_v57 }
  0xeb   :  { %3122 = vmatprep.subr.bf16.mxu0 %v4491_v62  ;;  %3154 = vmatprep.subr.bf16.mxu1 %v4493_v63 }
 0x1a0   :  { %v461_v36 = vpop.f32.mrb[0].mxu0  ;;  %v532_v48 = vpop.f32.mrb[0].mxu1 }
 0x1a1   :  { %v2838_v49 = vmul.f32 -1.442695, %v461_v36  ;;  %v463_v37 = vpop.f32.mrb[1].mxu0  ;;  %v534_v60 = vpop.f32.mrb[1].mxu1 }
 0x1a2   :  { %v2839_v12 = vmul.f32 -1.442695, %v463_v37  ;;  %v2840_v15 = vmul.f32 -1.442695, %v534_v60  ;;  %v5268_v60 = vld [vmem:[#allocation47_spill] sm:$0xff] }
 0x1a3   :  { %4039 = vpow2.f32 %v2838_v49 }
 0x1a4   :  { %4041 = vpow2.f32 %v2839_v12  ;;  %v213_v12 = vpop.permute.xlu0 %212 }
 0x1a5   :  { %4043 = vpow2.f32 %v2840_v15  ;;  %v5266_v15 = vld [vmem:[#allocation45_spill] sm:$0xff]  ;;  %vm214_vm1 = vcmp.eq.s32.totalorder %v213_v12, %v4595_v61  ;;  %v5274_v12 = vld [vmem:[#allocation32_spill] sm:$0xff] }
 0x1a6   :  { %4045 = vtanh.f32 %v532_v48  ;;  %v5267_v48 = vld [vmem:[#allocation46_spill] sm:$0xff] }
 0x1ad   :  { %v4040_v56 = vpop.eup %4039 }
 0x1ae   :  { %v4042_v47 = vpop.eup %4041  ;;  %v540_v57 = vadd.f32 1.0, %v4040_v56 }
 0x1af   :  { %v546_v62 = vadd.f32 1.0, %v4042_v47  ;;  %v4044_v8 = vpop.eup %4043  ;;  %v5262_v47 = vld [vmem:[#allocation41_spill] sm:$0xff] }
 0x1b0   :  { %4047 = vrcp.f32 %v540_v57  ;;  %v4046_v63 = vpop.eup %4045  ;;  %v553_v36 = vadd.f32 1.0, %v4044_v8  ;;  %v5263_v57 = vld [vmem:[#allocation42_spill] sm:$0xff]  ;;  %v5269_v8 = vmov 1.0  }
 0x1b1   :  { %4049 = vrcp.f32 %v546_v62  ;;  %v5264_v62 = vld [vmem:[#allocation43_spill] sm:$0xff] }
 0x1b2   :  { %4051 = vrcp.f32 %v553_v36  ;;  %v5270_v36 = vld [vmem:[#allocation28_spill] sm:$0xff] }
 0x1ba   :  { %v4048_v2 = vpop.eup %4047 }
 0x1bb   :  { %v4050_v44 = vpop.eup %4049  ;;  %v557_v39 = vmul.f32 %v4048_v2, %v4046_v63  ;;  %v5258_v2 = vld [vmem:[#allocation37_spill] sm:$0xff]  ;;  %v5265_v63 = vld [vmem:[#allocation44_spill] sm:$0xff] }
 0x1bc   :  { %v556_v38 = vmul.f32 0.0, %v4050_v44  ;;  %v4052_v49 = vpop.eup %4051  ;;  %v5261_v44 = vld [vmem:[#allocation40_spill] sm:$0xff] }
 0x1be   :  { %v4635_v29 = vadd.f32 %v557_v39, %v556_v38  ;;  %v5259_v38 = vld [vmem:[#allocation38_spill] sm:$0xff]  ;;  %v5260_v39 = vld [vmem:[#allocation39_spill] sm:$0xff] }
 0x1c0   :  { %4053 = vtanh.f32 %v4635_v29 }
 0x1ca   :  { %v4054_v37 = vpop.eup %4053 }
 0x1cb   :  { %v560_v56 = vmul.f32 %v4054_v37, %v4052_v49  ;;  %v5271_v49 = vld [vmem:[#allocation29_spill] sm:$0xff]  ;;  %v5272_v37 = vld [vmem:[#allocation30_spill] sm:$0xff] }
 0x1cd   :  { %626 = vmatmul.mubr.f32.vlgmr.msra.gmra.mrb[2].mxu0 %v560_v56  ;;  %697 = vmatmul.mubr.f32.vlgmr.msra.gmra.mrb[2].mxu1 %v560_v56  ;;  %v5273_v56 = vld [vmem:[#allocation31_spill] sm:$0xff] }
 0x1ce   :  { %3124 = vmatpush1.bf16.msra.mxu0 %v4497_v16  ;;  %3156 = vmatpush1.bf16.msra.mxu1 %v4499_v17 }
 0x1cf   :  { %3126 = vmatprep.subr.bf16.mxu0 %v4503_v25  ;;  %3158 = vmatprep.subr.bf16.mxu1 %v4505_v26 }
 0x1d0   :  { %767 = vmatprep.mubr.f32.mxu0 %v5257_v7  ;;  %838 = vmatprep.mubr.f32.mxu1 %v5257_v7 }
 0x1d2   :  { %3128 = vmatpush1.bf16.msra.mxu0 %v4511_v42  ;;  %3160 = vmatpush1.bf16.msra.mxu1 %v4513_v43 }
 0x1d3   :  { %3130 = vmatprep.subr.bf16.mxu0 %v4517_v50  ;;  %3162 = vmatprep.subr.bf16.mxu1 %v5258_v2 }
 0x1d6   :  { %3132 = vmatpush1.bf16.msra.mxu0 %v5259_v38  ;;  %3164 = vmatpush1.bf16.msra.mxu1 %v5260_v39 }
 0x1d7   :  { %3134 = vmatprep.subr.bf16.mxu0 %v5261_v44  ;;  %3166 = vmatprep.subr.bf16.mxu1 %v5262_v47 }
 0x1da   :  { %3136 = vmatpush1.bf16.msra.mxu0 %v5263_v57  ;;  %3168 = vmatpush1.bf16.msra.mxu1 %v5264_v62 }
 0x1db   :  { %3138 = vmatprep.subr.bf16.mxu0 %v5265_v63  ;;  %3170 = vmatprep.subr.bf16.mxu1 %v5266_v15 }
 0x1de   :  { %3140 = vmatpush1.bf16.msra.mxu0 %v5267_v48  ;;  %3172 = vmatpush1.bf16.msra.mxu1 %v5268_v60 }
 0x1df   :  { %3142 = vmatprep.subr.bf16.mxu0 %v4555_v34  ;;  %3174 = vmatprep.subr.bf16.mxu1 %v4557_v35 }
 0x1e2   :  { %3144 = vmatpush1.bf16.msra.mxu0 %v4561_v52  ;;  %3176 = vmatpush1.bf16.msra.mxu1 %v4563_v53 }
 0x1e3   :  { %3146 = vmatprep.subr.bf16.mxu0 %v4567_v1  ;;  %3178 = vmatprep.subr.bf16.mxu1 %v4569_v51 }
 0x1e6   :  { %3148 = vmatpush1.bf16.msra.mxu0 %v4573_v30  ;;  %3180 = vmatpush1.bf16.msra.mxu1 %v4575_v31 }
 0x1e7   :  { %3150 = vmatprep.subr.bf16.mxu0 %v4579_v19  ;;  %3182 = vmatprep.subr.bf16.mxu1 %v4581_v20 }
 0x1ea   :  { %3152 = vmatpush1.bf16.msra.mxu0 %v4585_v0  ;;  %3184 = vmatpush1.bf16.msra.mxu1 %v4587_v3 }
 0x1eb   :  { %3186 = vmatprep.subr.bf16.mxu0 %v4396_v5  ;;  %3218 = vmatprep.subr.bf16.mxu1 %v4398_v9 }
 0x1ed   :  { %2841 = vmatmul.mubr.msk.f32.vlgmr.msra.gmra.mrb[2].mxu0 %vm214_vm1, %v5269_v8  ;;  %2842 = vmatmul.mubr.msk.f32.vlgmr.msra.gmra.mrb[2].mxu1 %vm214_vm1, %v5269_v8 }
 0x1ee   :  { %3188 = vmatpush1.bf16.msra.mxu0 %v4401_v13  ;;  %3220 = vmatpush1.bf16.msra.mxu1 %v4403_v14 }
 0x1ef   :  { %3190 = vmatprep.subr.bf16.mxu0 %v4406_v18  ;;  %3222 = vmatprep.subr.bf16.mxu1 %v4410_v22 }
 0x1f0   :  { %933 = vmatprep.mubr.f32.mxu0 %v5257_v7  ;;  %1004 = vmatprep.mubr.f32.mxu1 %v5257_v7 }
 0x1f2   :  { %3192 = vmatpush1.bf16.msra.mxu0 %v4412_v23  ;;  %3224 = vmatpush1.bf16.msra.mxu1 %v4415_v27 }
 0x1f3   :  { %3194 = vmatprep.subr.bf16.mxu0 %v4418_v32  ;;  %3226 = vmatprep.subr.bf16.mxu1 %v4420_v33 }
 0x1f6   :  { %3196 = vmatpush1.bf16.msra.mxu0 %v4425_v40  ;;  %3228 = vmatpush1.bf16.msra.mxu1 %v4427_v41 }
 0x1f7   :  { %3198 = vmatprep.subr.bf16.mxu0 %v4431_v45  ;;  %3230 = vmatprep.subr.bf16.mxu1 %v4433_v46 }
 0x1fa   :  { %3200 = vmatpush1.bf16.msra.mxu0 %v4437_v54  ;;  %3232 = vmatpush1.bf16.msra.mxu1 %v4439_v55 }
 0x1fb   :  { %3202 = vmatprep.subr.bf16.mxu0 %v4443_v58  ;;  %3234 = vmatprep.subr.bf16.mxu1 %v4445_v59 }
 0x1fe   :  { %3204 = vmatpush1.bf16.msra.mxu0 %v4449_v4  ;;  %3236 = vmatpush1.bf16.msra.mxu1 %v4451_v6  ;;  %v5275_v6 = vld [vmem:[#allocation33_spill] sm:$0xff] }
 0x1ff   :  { %3206 = vmatprep.subr.bf16.mxu0 %v4455_v10  ;;  %3238 = vmatprep.subr.bf16.mxu1 %v4457_v11  ;;  %v5276_v10 = vld [vmem:[#allocation34_spill] sm:$0xff]  ;;  %v5277_v11 = vld [vmem:[#allocation35_spill] sm:$0xff] }
 0x202   :  { %3208 = vmatpush1.bf16.msra.mxu0 %v4461_v21  ;;  %3240 = vmatpush1.bf16.msra.mxu1 %v4463_v24  ;;  %v5278_v21 = vld [vmem:[#allocation36_spill] sm:$0xff]  ;;  %v4299_v24 = vmov 3  }
 0x203   :  { %3210 = vmatprep.subr.bf16.mxu0 %v4467_v28  ;;  %3242 = vmatprep.subr.bf16.mxu1 %v5270_v36  ;;  %v5279_v28 = vld [vmem:[#allocation15_spill] sm:$0xff] }
 0x204   :  { %4033 = vset.pattern.permute.xlu1 %v4299_v24 }
 0x205   :  { %224 = vperm.xlu1 %4033, %v5279_v28  }
 0x206   :  { %3212 = vmatpush1.bf16.msra.mxu0 %v5271_v49  ;;  %3244 = vmatpush1.bf16.msra.mxu1 %v5272_v37 }
 0x207   :  { %3214 = vmatprep.subr.bf16.mxu0 %v5273_v56  ;;  %3246 = vmatprep.subr.bf16.mxu1 %v5274_v12 }
 0x20a   :  { %3216 = vmatpush1.bf16.msra.mxu0 %v5275_v6  ;;  %3248 = vmatpush1.bf16.msra.mxu1 %v5276_v10 }
 0x20b   :  { %3250 = vmatprep.subr.bf16.mxu0 %v5277_v11  ;;  %3282 = vmatprep.subr.bf16.mxu1 %v5278_v21 }
 0x2c0   :  { %v769_v36 = vpop.f32.mrb[2].mxu0  ;;  %v840_v49 = vpop.f32.mrb[2].mxu1 }
 0x2c1   :  { %v2843_v4 = vmul.f32 -1.442695, %v769_v36  ;;  %v771_v37 = vpop.f32.mrb[3].mxu0  ;;  %v842_v59 = vpop.f32.mrb[3].mxu1 }
 0x2c2   :  { %v2844_v56 = vmul.f32 -1.442695, %v771_v37  ;;  %v2845_v12 = vmul.f32 -1.442695, %v842_v59 }
 0x2c3   :  { %4055 = vpow2.f32 %v2843_v4 }
 0x2c4   :  { %4057 = vpow2.f32 %v2844_v56  ;;  %v5288_v56 = vld [vmem:[#allocation24_spill] sm:$0xff] }
 0x2c5   :  { %4059 = vpow2.f32 %v2845_v12  ;;  %v5289_v12 = vld [vmem:[#allocation25_spill] sm:$0xff] }
 0x2c6   :  { %4061 = vtanh.f32 %v840_v49  ;;  %v5287_v49 = vld [vmem:[#allocation23_spill] sm:$0xff] }
 0x2cd   :  { %v4056_v6 = vpop.eup %4055 }
 0x2ce   :  { %v4058_v58 = vpop.eup %4057  ;;  %v848_v10 = vadd.f32 1.0, %v4056_v6 }
 0x2cf   :  { %v854_v11 = vadd.f32 1.0, %v4058_v58  ;;  %v4060_v24 = vpop.eup %4059  ;;  %v5282_v58 = vld [vmem:[#allocation18_spill] sm:$0xff] }
 0x2d0   :  { %4063 = vrcp.f32 %v848_v10  ;;  %v4062_v21 = vpop.eup %4061  ;;  %v861_v36 = vadd.f32 1.0, %v4060_v24  ;;  %v5283_v10 = vld [vmem:[#allocation19_spill] sm:$0xff]  ;;  %v5290_v24 = vld [vmem:[#allocation26_spill] sm:$0xff] }
 0x2d1   :  { %4065 = vrcp.f32 %v854_v11  ;;  %v5284_v11 = vld [vmem:[#allocation20_spill] sm:$0xff] }
 0x2d2   :  { %4067 = vrcp.f32 %v861_v36  ;;  %v5292_v36 = vld [vmem:[#allocation28_spill] sm:$0xff] }
 0x2da   :  { %v4064_v28 = vpop.eup %4063 }
 0x2db   :  { %v4066_v55 = vpop.eup %4065  ;;  %v865_v54 = vmul.f32 %v4064_v28, %v4062_v21  ;;  %v5285_v21 = vld [vmem:[#allocation21_spill] sm:$0xff]  ;;  %v5291_v28 = vld [vmem:[#allocation27_spill] sm:$0xff] }
 0x2dc   :  { %v864_v46 = vmul.f32 %v4066_v55, %v4635_v29  ;;  %v4068_v59 = vpop.eup %4067  ;;  %v5281_v55 = vld [vmem:[#allocation17_spill] sm:$0xff]  ;;  %v5286_v29 = vld [vmem:[#allocation22_spill] sm:$0xff] }
 0x2de   :  { %v4711_v37 = vadd.f32 %v865_v54, %v864_v46  ;;  %v219_v46 = vpop.permute.xlu1 %218  ;;  %v5280_v54 = vld [vmem:[#allocation16_spill] sm:$0xff] }
 0x2df   :  { %vm220_vm2 = vcmp.eq.s32.totalorder %v219_v46, %v4595_v61  ;;  %v5296_v46 = vld [vmem:[#allocation32_spill] sm:$0xff] }
 0x2e0   :  { %4069 = vtanh.f32 %v4711_v37 }
 0x2ea   :  { %v4070_v4 = vpop.eup %4069 }
 0x2eb   :  { %v868_v6 = vmul.f32 %v4070_v4, %v4068_v59  ;;  %v5293_v59 = vld [vmem:[#allocation29_spill] sm:$0xff]  ;;  %v5294_v4 = vld [vmem:[#allocation30_spill] sm:$0xff] }
 0x2ed   :  { %934 = vmatmul.mubr.f32.vlgmr.msra.gmra.mrb[4].mxu0 %v868_v6  ;;  %1005 = vmatmul.mubr.f32.vlgmr.msra.gmra.mrb[4].mxu1 %v868_v6  ;;  %v5295_v6 = vld [vmem:[#allocation31_spill] sm:$0xff] }
 0x2ee   :  { %3252 = vmatpush1.bf16.msra.mxu0 %v4497_v16  ;;  %3284 = vmatpush1.bf16.msra.mxu1 %v4499_v17 }
 0x2ef   :  { %3254 = vmatprep.subr.bf16.mxu0 %v4503_v25  ;;  %3286 = vmatprep.subr.bf16.mxu1 %v4505_v26 }
 0x2f0   :  { %1075 = vmatprep.mubr.f32.mxu0 %v5257_v7  ;;  %1146 = vmatprep.mubr.f32.mxu1 %v5257_v7 }
 0x2f2   :  { %3256 = vmatpush1.bf16.msra.mxu0 %v4511_v42  ;;  %3288 = vmatpush1.bf16.msra.mxu1 %v4513_v43 }
 0x2f3   :  { %3258 = vmatprep.subr.bf16.mxu0 %v4517_v50  ;;  %3290 = vmatprep.subr.bf16.mxu1 %v5258_v2 }
 0x2f6   :  { %3260 = vmatpush1.bf16.msra.mxu0 %v5259_v38  ;;  %3292 = vmatpush1.bf16.msra.mxu1 %v5260_v39 }
 0x2f7   :  { %3262 = vmatprep.subr.bf16.mxu0 %v5261_v44  ;;  %3294 = vmatprep.subr.bf16.mxu1 %v5262_v47 }
 0x2fa   :  { %3264 = vmatpush1.bf16.msra.mxu0 %v5263_v57  ;;  %3296 = vmatpush1.bf16.msra.mxu1 %v5264_v62 }
 0x2fb   :  { %3266 = vmatprep.subr.bf16.mxu0 %v5265_v63  ;;  %3298 = vmatprep.subr.bf16.mxu1 %v5266_v15 }
 0x2fe   :  { %3268 = vmatpush1.bf16.msra.mxu0 %v5267_v48  ;;  %3300 = vmatpush1.bf16.msra.mxu1 %v5268_v60 }
 0x2ff   :  { %3270 = vmatprep.subr.bf16.mxu0 %v4555_v34  ;;  %3302 = vmatprep.subr.bf16.mxu1 %v4557_v35 }
 0x302   :  { %3272 = vmatpush1.bf16.msra.mxu0 %v4561_v52  ;;  %3304 = vmatpush1.bf16.msra.mxu1 %v4563_v53 }
 0x303   :  { %3274 = vmatprep.subr.bf16.mxu0 %v4567_v1  ;;  %3306 = vmatprep.subr.bf16.mxu1 %v4569_v51 }
 0x306   :  { %3276 = vmatpush1.bf16.msra.mxu0 %v4573_v30  ;;  %3308 = vmatpush1.bf16.msra.mxu1 %v4575_v31 }
 0x307   :  { %3278 = vmatprep.subr.bf16.mxu0 %v4579_v19  ;;  %3310 = vmatprep.subr.bf16.mxu1 %v4581_v20 }
 0x30a   :  { %3280 = vmatpush1.bf16.msra.mxu0 %v4585_v0  ;;  %3312 = vmatpush1.bf16.msra.mxu1 %v4587_v3 }
 0x30b   :  { %3314 = vmatprep.subr.bf16.mxu0 %v4396_v5  ;;  %3346 = vmatprep.subr.bf16.mxu1 %v4398_v9 }
 0x30d   :  { %2846 = vmatmul.mubr.msk.f32.vlgmr.msra.gmra.mrb[4].mxu0 %vm220_vm2, %v5269_v8  ;;  %2847 = vmatmul.mubr.msk.f32.vlgmr.msra.gmra.mrb[4].mxu1 %vm220_vm2, %v5269_v8 }
 0x30e   :  { %3316 = vmatpush1.bf16.msra.mxu0 %v4401_v13  ;;  %3348 = vmatpush1.bf16.msra.mxu1 %v4403_v14 }
 0x30f   :  { %3318 = vmatprep.subr.bf16.mxu0 %v4406_v18  ;;  %3350 = vmatprep.subr.bf16.mxu1 %v4410_v22 }
 0x310   :  { %1241 = vmatprep.mubr.f32.mxu0 %v5257_v7  ;;  %1312 = vmatprep.mubr.f32.mxu1 %v5257_v7 }
 0x312   :  { %3320 = vmatpush1.bf16.msra.mxu0 %v4412_v23  ;;  %3352 = vmatpush1.bf16.msra.mxu1 %v4415_v27 }
 0x313   :  { %3322 = vmatprep.subr.bf16.mxu0 %v4418_v32  ;;  %3354 = vmatprep.subr.bf16.mxu1 %v4420_v33 }
 0x316   :  { %3324 = vmatpush1.bf16.msra.mxu0 %v4425_v40  ;;  %3356 = vmatpush1.bf16.msra.mxu1 %v4427_v41 }
 0x317   :  { %3326 = vmatprep.subr.bf16.mxu0 %v4431_v45  ;;  %3358 = vmatprep.subr.bf16.mxu1 %v5280_v54 }
 0x31a   :  { %3328 = vmatpush1.bf16.msra.mxu0 %v5281_v55  ;;  %3360 = vmatpush1.bf16.msra.mxu1 %v5282_v58 }
 0x31b   :  { %3330 = vmatprep.subr.bf16.mxu0 %v5283_v10  ;;  %3362 = vmatprep.subr.bf16.mxu1 %v5284_v11 }
 0x31e   :  { %3332 = vmatpush1.bf16.msra.mxu0 %v5285_v21  ;;  %3364 = vmatpush1.bf16.msra.mxu1 %v5286_v29  ;;  %v5297_v29 = vld [vmem:[#allocation33_spill] sm:$0xff] }
 0x31f   :  { %3334 = vmatprep.subr.bf16.mxu0 %v5287_v49  ;;  %3366 = vmatprep.subr.bf16.mxu1 %v5288_v56  ;;  %v5298_v49 = vld [vmem:[#allocation34_spill] sm:$0xff]  ;;  %v5299_v56 = vld [vmem:[#allocation35_spill] sm:$0xff] }
 0x322   :  { %3336 = vmatpush1.bf16.msra.mxu0 %v5289_v12  ;;  %3368 = vmatpush1.bf16.msra.mxu1 %v5290_v24  ;;  %v5300_v12 = vld [vmem:[#allocation36_spill] sm:$0xff]  ;;  %v4300_v24 = vmov 4  }
 0x323   :  { %3338 = vmatprep.subr.bf16.mxu0 %v5291_v28  ;;  %3370 = vmatprep.subr.bf16.mxu1 %v5292_v36  ;;  %v4785_v28 = vld [vmem:[#allocation2] sm:$0xff] }
 0x324   :  { %4034 = vset.pattern.permute.xlu1 %v4300_v24  ;;  %5301 = vst [vmem:[#allocation37_spill] sm:$0xff] %v4785_v28 }
 0x325   :  { %230 = vperm.xlu1 %4034, %v4785_v28  }
 0x326   :  { %3340 = vmatpush1.bf16.msra.mxu0 %v5293_v59  ;;  %3372 = vmatpush1.bf16.msra.mxu1 %v5294_v4 }
 0x327   :  { %3342 = vmatprep.subr.bf16.mxu0 %v5295_v6  ;;  %3374 = vmatprep.subr.bf16.mxu1 %v5296_v46 }
 0x32a   :  { %3344 = vmatpush1.bf16.msra.mxu0 %v5297_v29  ;;  %3376 = vmatpush1.bf16.msra.mxu1 %v5298_v49 }
 0x32b   :  { %3378 = vmatprep.subr.bf16.mxu0 %v5299_v56  ;;  %3410 = vmatprep.subr.bf16.mxu1 %v5300_v12 }
 0x3e0   :  { %v1077_v59 = vpop.f32.mrb[4].mxu0  ;;  %v1148_v4 = vpop.f32.mrb[4].mxu1 }
 0x3e1   :  { %v2848_v36 = vmul.f32 -1.442695, %v1077_v59  ;;  %v1079_v6 = vpop.f32.mrb[5].mxu0  ;;  %v1150_v21 = vpop.f32.mrb[5].mxu1 }
 0x3e2   :  { %v2849_v46 = vmul.f32 -1.442695, %v1079_v6  ;;  %v2850_v29 = vmul.f32 -1.442695, %v1150_v21 }
 0x3e3   :  { %4071 = vpow2.f32 %v2848_v36  ;;  %v5310_v36 = vld [vmem:[#allocation24_spill] sm:$0xff] }
 0x3e4   :  { %4073 = vpow2.f32 %v2849_v46  ;;  %v5312_v46 = vld [vmem:[#allocation26_spill] sm:$0xff] }
 0x3e5   :  { %4075 = vpow2.f32 %v2850_v29 }
 0x3e6   :  { %4077 = vtanh.f32 %v1148_v4  ;;  %v5311_v4 = vld [vmem:[#allocation25_spill] sm:$0xff] }
 0x3ed   :  { %v4072_v49 = vpop.eup %4071 }
 0x3ee   :  { %v4074_v11 = vpop.eup %4073  ;;  %v1156_v56 = vadd.f32 1.0, %v4072_v49 }
 0x3ef   :  { %v1162_v12 = vadd.f32 1.0, %v4074_v11  ;;  %v4076_v24 = vpop.eup %4075  ;;  %v5306_v11 = vld [vmem:[#allocation20_spill] sm:$0xff] }
 0x3f0   :  { %4079 = vrcp.f32 %v1156_v56  ;;  %v4078_v10 = vpop.eup %4077  ;;  %v1169_v59 = vadd.f32 1.0, %v4076_v24  ;;  %v5307_v56 = vld [vmem:[#allocation21_spill] sm:$0xff]  ;;  %v5313_v24 = vld [vmem:[#allocation27_spill] sm:$0xff] }
 0x3f1   :  { %4081 = vrcp.f32 %v1162_v12  ;;  %v5308_v12 = vld [vmem:[#allocation22_spill] sm:$0xff] }
 0x3f2   :  { %4083 = vrcp.f32 %v1169_v59  ;;  %v5314_v59 = vld [vmem:[#allocation28_spill] sm:$0xff] }
 0x3fa   :  { %v4080_v28 = vpop.eup %4079 }
 0x3fb   :  { %v4082_v58 = vpop.eup %4081  ;;  %v1173_v55 = vmul.f32 %v4080_v28, %v4078_v10  ;;  %v5305_v10 = vld [vmem:[#allocation19_spill] sm:$0xff] }
 0x3fc   :  { %v1172_v54 = vmul.f32 %v4082_v58, %v4711_v37  ;;  %v4084_v21 = vpop.eup %4083  ;;  %v225_v37 = vpop.permute.xlu1 %224  ;;  %v5304_v58 = vld [vmem:[#allocation18_spill] sm:$0xff]  ;;  %v5309_v28 = vld [vmem:[#allocation23_spill] sm:$0xff] }
 0x3fd   :  { %vm226_vm3 = vcmp.eq.s32.totalorder %v225_v37, %v4595_v61  ;;  %v5318_v37 = vld [vmem:[#allocation32_spill] sm:$0xff] }
 0x3fe   :  { %v4789_v6 = vadd.f32 %v1173_v55, %v1172_v54  ;;  %v5302_v54 = vld [vmem:[#allocation16_spill] sm:$0xff]  ;;  %v5303_v55 = vld [vmem:[#allocation17_spill] sm:$0xff] }
 0x400   :  { %4085 = vtanh.f32 %v4789_v6 }
 0x40a   :  { %v4086_v49 = vpop.eup %4085 }
 0x40b   :  { %v1176_v29 = vmul.f32 %v4086_v49, %v4084_v21  ;;  %v5315_v21 = vld [vmem:[#allocation29_spill] sm:$0xff]  ;;  %v5316_v49 = vld [vmem:[#allocation30_spill] sm:$0xff] }
 0x40d   :  { %1242 = vmatmul.mubr.f32.vlgmr.msra.gmra.mrb[6].mxu0 %v1176_v29  ;;  %1313 = vmatmul.mubr.f32.vlgmr.msra.gmra.mrb[6].mxu1 %v1176_v29  ;;  %v5317_v29 = vld [vmem:[#allocation31_spill] sm:$0xff] }
 0x40e   :  { %3380 = vmatpush1.bf16.msra.mxu0 %v4497_v16  ;;  %3412 = vmatpush1.bf16.msra.mxu1 %v4499_v17 }
 0x40f   :  { %3382 = vmatprep.subr.bf16.mxu0 %v4503_v25  ;;  %3414 = vmatprep.subr.bf16.mxu1 %v4505_v26 }
 0x410   :  { %1383 = vmatprep.mubr.f32.mxu0 %v5257_v7  ;;  %1454 = vmatprep.mubr.f32.mxu1 %v5257_v7 }
 0x412   :  { %3384 = vmatpush1.bf16.msra.mxu0 %v4511_v42  ;;  %3416 = vmatpush1.bf16.msra.mxu1 %v4513_v43 }
 0x413   :  { %3386 = vmatprep.subr.bf16.mxu0 %v4517_v50  ;;  %3418 = vmatprep.subr.bf16.mxu1 %v5258_v2 }
 0x416   :  { %3388 = vmatpush1.bf16.msra.mxu0 %v5259_v38  ;;  %3420 = vmatpush1.bf16.msra.mxu1 %v5260_v39 }
 0x417   :  { %3390 = vmatprep.subr.bf16.mxu0 %v5261_v44  ;;  %3422 = vmatprep.subr.bf16.mxu1 %v5262_v47 }
 0x41a   :  { %3392 = vmatpush1.bf16.msra.mxu0 %v5263_v57  ;;  %3424 = vmatpush1.bf16.msra.mxu1 %v5264_v62 }
 0x41b   :  { %3394 = vmatprep.subr.bf16.mxu0 %v5265_v63  ;;  %3426 = vmatprep.subr.bf16.mxu1 %v5266_v15 }
 0x41e   :  { %3396 = vmatpush1.bf16.msra.mxu0 %v5267_v48  ;;  %3428 = vmatpush1.bf16.msra.mxu1 %v5268_v60 }
 0x41f   :  { %3398 = vmatprep.subr.bf16.mxu0 %v4555_v34  ;;  %3430 = vmatprep.subr.bf16.mxu1 %v4557_v35 }
 0x422   :  { %3400 = vmatpush1.bf16.msra.mxu0 %v4561_v52  ;;  %3432 = vmatpush1.bf16.msra.mxu1 %v4563_v53 }
 0x423   :  { %3402 = vmatprep.subr.bf16.mxu0 %v4567_v1  ;;  %3434 = vmatprep.subr.bf16.mxu1 %v4569_v51 }
 0x426   :  { %3404 = vmatpush1.bf16.msra.mxu0 %v4573_v30  ;;  %3436 = vmatpush1.bf16.msra.mxu1 %v4575_v31 }
 0x427   :  { %3406 = vmatprep.subr.bf16.mxu0 %v4579_v19  ;;  %3438 = vmatprep.subr.bf16.mxu1 %v4581_v20 }
 0x42a   :  { %3408 = vmatpush1.bf16.msra.mxu0 %v4585_v0  ;;  %3440 = vmatpush1.bf16.msra.mxu1 %v4587_v3 }
 0x42b   :  { %3442 = vmatprep.subr.bf16.mxu0 %v4396_v5  ;;  %3474 = vmatprep.subr.bf16.mxu1 %v4398_v9 }
 0x42d   :  { %2851 = vmatmul.mubr.msk.f32.vlgmr.msra.gmra.mrb[6].mxu0 %vm226_vm3, %v5269_v8  ;;  %2852 = vmatmul.mubr.msk.f32.vlgmr.msra.gmra.mrb[6].mxu1 %vm226_vm3, %v5269_v8 }
 0x42e   :  { %3444 = vmatpush1.bf16.msra.mxu0 %v4401_v13  ;;  %3476 = vmatpush1.bf16.msra.mxu1 %v4403_v14 }
 0x42f   :  { %3446 = vmatprep.subr.bf16.mxu0 %v4406_v18  ;;  %3478 = vmatprep.subr.bf16.mxu1 %v4410_v22 }
 0x430   :  { %1549 = vmatprep.mubr.f32.mxu0 %v5257_v7  ;;  %1620 = vmatprep.mubr.f32.mxu1 %v5257_v7 }
 0x432   :  { %3448 = vmatpush1.bf16.msra.mxu0 %v4412_v23  ;;  %3480 = vmatpush1.bf16.msra.mxu1 %v4415_v27 }
 0x433   :  { %3450 = vmatprep.subr.bf16.mxu0 %v4418_v32  ;;  %3482 = vmatprep.subr.bf16.mxu1 %v4420_v33 }
 0x436   :  { %3452 = vmatpush1.bf16.msra.mxu0 %v4425_v40  ;;  %3484 = vmatpush1.bf16.msra.mxu1 %v4427_v41 }
 0x437   :  { %3454 = vmatprep.subr.bf16.mxu0 %v4431_v45  ;;  %3486 = vmatprep.subr.bf16.mxu1 %v5302_v54 }
 0x43a   :  { %3456 = vmatpush1.bf16.msra.mxu0 %v5303_v55  ;;  %3488 = vmatpush1.bf16.msra.mxu1 %v5304_v58 }
 0x43b   :  { %3458 = vmatprep.subr.bf16.mxu0 %v5305_v10  ;;  %3490 = vmatprep.subr.bf16.mxu1 %v5306_v11 }
 0x43e   :  { %3460 = vmatpush1.bf16.msra.mxu0 %v5307_v56  ;;  %3492 = vmatpush1.bf16.msra.mxu1 %v5308_v12  ;;  %v5319_v12 = vld [vmem:[#allocation33_spill] sm:$0xff] }
 0x43f   :  { %3462 = vmatprep.subr.bf16.mxu0 %v5309_v28  ;;  %3494 = vmatprep.subr.bf16.mxu1 %v5310_v36  ;;  %v5320_v28 = vld [vmem:[#allocation34_spill] sm:$0xff]  ;;  %v5321_v36 = vld [vmem:[#allocation35_spill] sm:$0xff] }
 0x442   :  { %3464 = vmatpush1.bf16.msra.mxu0 %v5311_v4  ;;  %3496 = vmatpush1.bf16.msra.mxu1 %v5312_v46  ;;  %v5322_v4 = vld [vmem:[#allocation36_spill] sm:$0xff]  ;;  %v4301_v46 = vmov 5  }
 0x443   :  { %3466 = vmatprep.subr.bf16.mxu0 %v5313_v24  ;;  %3498 = vmatprep.subr.bf16.mxu1 %v5314_v59  ;;  %v5323_v24 = vld [vmem:[#allocation37_spill] sm:$0xff] }
 0x444   :  { %4035 = vset.pattern.permute.xlu0 %v4301_v46 }
 0x445   :  { %236 = vperm.xlu0 %4035, %v5323_v24  }
 0x446   :  { %3468 = vmatpush1.bf16.msra.mxu0 %v5315_v21  ;;  %3500 = vmatpush1.bf16.msra.mxu1 %v5316_v49 }
 0x447   :  { %3470 = vmatprep.subr.bf16.mxu0 %v5317_v29  ;;  %3502 = vmatprep.subr.bf16.mxu1 %v5318_v37 }
 0x44a   :  { %3472 = vmatpush1.bf16.msra.mxu0 %v5319_v12  ;;  %3504 = vmatpush1.bf16.msra.mxu1 %v5320_v28 }
 0x44b   :  { %3506 = vmatprep.subr.bf16.mxu0 %v5321_v36  ;;  %3538 = vmatprep.subr.bf16.mxu1 %v5322_v4 }
 0x500   :  { %v1385_v59 = vpop.f32.mrb[6].mxu0  ;;  %v1456_v21 = vpop.f32.mrb[6].mxu1 }
 0x501   :  { %v2853_v56 = vmul.f32 -1.442695, %v1385_v59  ;;  %v1387_v49 = vpop.f32.mrb[7].mxu0  ;;  %v1458_v11 = vpop.f32.mrb[7].mxu1 }
 0x502   :  { %v2854_v29 = vmul.f32 -1.442695, %v1387_v49  ;;  %v2855_v37 = vmul.f32 -1.442695, %v1458_v11 }
 0x503   :  { %4087 = vpow2.f32 %v2853_v56 }
 0x504   :  { %4089 = vpow2.f32 %v2854_v29  ;;  %v5333_v29 = vld [vmem:[#allocation25_spill] sm:$0xff] }
 0x505   :  { %4091 = vpow2.f32 %v2855_v37  ;;  %v5334_v37 = vld [vmem:[#allocation26_spill] sm:$0xff] }
 0x506   :  { %4093 = vtanh.f32 %v1456_v21  ;;  %v5332_v21 = vld [vmem:[#allocation24_spill] sm:$0xff] }
 0x50d   :  { %v4088_v12 = vpop.eup %4087 }
 0x50e   :  { %v4090_v10 = vpop.eup %4089  ;;  %v1464_v28 = vadd.f32 1.0, %v4088_v12 }
 0x50f   :  { %v1470_v36 = vadd.f32 1.0, %v4090_v10  ;;  %v4092_v46 = vpop.eup %4091  ;;  %v5327_v10 = vld [vmem:[#allocation19_spill] sm:$0xff] }
 0x510   :  { %4095 = vrcp.f32 %v1464_v28  ;;  %v4094_v4 = vpop.eup %4093  ;;  %v1477_v59 = vadd.f32 1.0, %v4092_v46  ;;  %v5328_v28 = vld [vmem:[#allocation20_spill] sm:$0xff]  ;;  %v5335_v46 = vld [vmem:[#allocation27_spill] sm:$0xff] }
 0x511   :  { %4097 = vrcp.f32 %v1470_v36  ;;  %v5329_v36 = vld [vmem:[#allocation21_spill] sm:$0xff] }
 0x512   :  { %4099 = vrcp.f32 %v1477_v59  ;;  %v5336_v59 = vld [vmem:[#allocation28_spill] sm:$0xff] }
 0x51a   :  { %v4096_v24 = vpop.eup %4095 }
 0x51b   :  { %v4098_v58 = vpop.eup %4097  ;;  %v1481_v55 = vmul.f32 %v4096_v24, %v4094_v4  ;;  %v5330_v4 = vld [vmem:[#allocation22_spill] sm:$0xff]  ;;  %v5331_v24 = vld [vmem:[#allocation23_spill] sm:$0xff] }
 0x51c   :  { %v1480_v54 = vmul.f32 %v4098_v58, %v4789_v6  ;;  %v4100_v11 = vpop.eup %4099  ;;  %v231_v6 = vpop.permute.xlu1 %230  ;;  %v5326_v58 = vld [vmem:[#allocation18_spill] sm:$0xff] }
 0x51d   :  { %vm232_vm4 = vcmp.eq.s32.totalorder %v231_v6, %v4595_v61  ;;  %v5340_v6 = vld [vmem:[#allocation32_spill] sm:$0xff] }
 0x51e   :  { %v4865_v49 = vadd.f32 %v1481_v55, %v1480_v54  ;;  %v5324_v54 = vld [vmem:[#allocation16_spill] sm:$0xff]  ;;  %v5325_v55 = vld [vmem:[#allocation17_spill] sm:$0xff] }
 0x520   :  { %4101 = vtanh.f32 %v4865_v49 }
 0x52a   :  { %v4102_v56 = vpop.eup %4101 }
 0x52b   :  { %v1484_v12 = vmul.f32 %v4102_v56, %v4100_v11  ;;  %v5337_v11 = vld [vmem:[#allocation29_spill] sm:$0xff]  ;;  %v5338_v56 = vld [vmem:[#allocation30_spill] sm:$0xff] }
 0x52d   :  { %1550 = vmatmul.mubr.f32.vlgmr.msra.gmra.mrb[8].mxu0 %v1484_v12  ;;  %1621 = vmatmul.mubr.f32.vlgmr.msra.gmra.mrb[8].mxu1 %v1484_v12  ;;  %v5339_v12 = vld [vmem:[#allocation31_spill] sm:$0xff] }
 0x52e   :  { %3508 = vmatpush1.bf16.msra.mxu0 %v4497_v16  ;;  %3540 = vmatpush1.bf16.msra.mxu1 %v4499_v17 }
 0x52f   :  { %3510 = vmatprep.subr.bf16.mxu0 %v4503_v25  ;;  %3542 = vmatprep.subr.bf16.mxu1 %v4505_v26 }
 0x530   :  { %1691 = vmatprep.mubr.f32.mxu0 %v5257_v7  ;;  %1762 = vmatprep.mubr.f32.mxu1 %v5257_v7 }
 0x532   :  { %3512 = vmatpush1.bf16.msra.mxu0 %v4511_v42  ;;  %3544 = vmatpush1.bf16.msra.mxu1 %v4513_v43 }
 0x533   :  { %3514 = vmatprep.subr.bf16.mxu0 %v4517_v50  ;;  %3546 = vmatprep.subr.bf16.mxu1 %v5258_v2 }
 0x536   :  { %3516 = vmatpush1.bf16.msra.mxu0 %v5259_v38  ;;  %3548 = vmatpush1.bf16.msra.mxu1 %v5260_v39 }
 0x537   :  { %3518 = vmatprep.subr.bf16.mxu0 %v5261_v44  ;;  %3550 = vmatprep.subr.bf16.mxu1 %v5262_v47 }
 0x53a   :  { %3520 = vmatpush1.bf16.msra.mxu0 %v5263_v57  ;;  %3552 = vmatpush1.bf16.msra.mxu1 %v5264_v62 }
 0x53b   :  { %3522 = vmatprep.subr.bf16.mxu0 %v5265_v63  ;;  %3554 = vmatprep.subr.bf16.mxu1 %v5266_v15 }
 0x53e   :  { %3524 = vmatpush1.bf16.msra.mxu0 %v5267_v48  ;;  %3556 = vmatpush1.bf16.msra.mxu1 %v5268_v60 }
 0x53f   :  { %3526 = vmatprep.subr.bf16.mxu0 %v4555_v34  ;;  %3558 = vmatprep.subr.bf16.mxu1 %v4557_v35 }
 0x542   :  { %3528 = vmatpush1.bf16.msra.mxu0 %v4561_v52  ;;  %3560 = vmatpush1.bf16.msra.mxu1 %v4563_v53 }
 0x543   :  { %3530 = vmatprep.subr.bf16.mxu0 %v4567_v1  ;;  %3562 = vmatprep.subr.bf16.mxu1 %v4569_v51 }
 0x546   :  { %3532 = vmatpush1.bf16.msra.mxu0 %v4573_v30  ;;  %3564 = vmatpush1.bf16.msra.mxu1 %v4575_v31 }
 0x547   :  { %3534 = vmatprep.subr.bf16.mxu0 %v4579_v19  ;;  %3566 = vmatprep.subr.bf16.mxu1 %v4581_v20 }
 0x54a   :  { %3536 = vmatpush1.bf16.msra.mxu0 %v4585_v0  ;;  %3568 = vmatpush1.bf16.msra.mxu1 %v4587_v3 }
 0x54b   :  { %3570 = vmatprep.subr.bf16.mxu0 %v4396_v5  ;;  %3602 = vmatprep.subr.bf16.mxu1 %v4398_v9 }
 0x54d   :  { %2856 = vmatmul.mubr.msk.f32.vlgmr.msra.gmra.mrb[8].mxu0 %vm232_vm4, %v5269_v8  ;;  %2857 = vmatmul.mubr.msk.f32.vlgmr.msra.gmra.mrb[8].mxu1 %vm232_vm4, %v5269_v8 }
 0x54e   :  { %3572 = vmatpush1.bf16.msra.mxu0 %v4401_v13  ;;  %3604 = vmatpush1.bf16.msra.mxu1 %v4403_v14 }
 0x54f   :  { %3574 = vmatprep.subr.bf16.mxu0 %v4406_v18  ;;  %3606 = vmatprep.subr.bf16.mxu1 %v4410_v22 }
 0x550   :  { %1857 = vmatprep.mubr.f32.mxu0 %v5257_v7  ;;  %1928 = vmatprep.mubr.f32.mxu1 %v5257_v7 }
 0x552   :  { %3576 = vmatpush1.bf16.msra.mxu0 %v4412_v23  ;;  %3608 = vmatpush1.bf16.msra.mxu1 %v4415_v27 }
 0x553   :  { %3578 = vmatprep.subr.bf16.mxu0 %v4418_v32  ;;  %3610 = vmatprep.subr.bf16.mxu1 %v4420_v33 }
 0x556   :  { %3580 = vmatpush1.bf16.msra.mxu0 %v4425_v40  ;;  %3612 = vmatpush1.bf16.msra.mxu1 %v4427_v41 }
 0x557   :  { %3582 = vmatprep.subr.bf16.mxu0 %v4431_v45  ;;  %3614 = vmatprep.subr.bf16.mxu1 %v5324_v54 }
 0x55a   :  { %3584 = vmatpush1.bf16.msra.mxu0 %v5325_v55  ;;  %3616 = vmatpush1.bf16.msra.mxu1 %v5326_v58 }
 0x55b   :  { %3586 = vmatprep.subr.bf16.mxu0 %v5327_v10  ;;  %3618 = vmatprep.subr.bf16.mxu1 %v5328_v28 }
 0x55e   :  { %3588 = vmatpush1.bf16.msra.mxu0 %v5329_v36  ;;  %3620 = vmatpush1.bf16.msra.mxu1 %v5330_v4  ;;  %v5341_v4 = vld [vmem:[#allocation33_spill] sm:$0xff] }
 0x55f   :  { %3590 = vmatprep.subr.bf16.mxu0 %v5331_v24  ;;  %3622 = vmatprep.subr.bf16.mxu1 %v5332_v21  ;;  %v5342_v24 = vld [vmem:[#allocation34_spill] sm:$0xff]  ;;  %v5343_v21 = vld [vmem:[#allocation35_spill] sm:$0xff] }
 0x562   :  { %3592 = vmatpush1.bf16.msra.mxu0 %v5333_v29  ;;  %3624 = vmatpush1.bf16.msra.mxu1 %v5334_v37  ;;  %v5344_v29 = vld [vmem:[#allocation36_spill] sm:$0xff]  ;;  %v4302_v37 = vmov 6  }
 0x563   :  { %3594 = vmatprep.subr.bf16.mxu0 %v5335_v46  ;;  %3626 = vmatprep.subr.bf16.mxu1 %v5336_v59  ;;  %v5345_v46 = vld [vmem:[#allocation37_spill] sm:$0xff] }
 0x564   :  { %4036 = vset.pattern.permute.xlu1 %v4302_v37 }
 0x565   :  { %242 = vperm.xlu1 %4036, %v5345_v46  }
 0x566   :  { %3596 = vmatpush1.bf16.msra.mxu0 %v5337_v11  ;;  %3628 = vmatpush1.bf16.msra.mxu1 %v5338_v56 }
 0x567   :  { %3598 = vmatprep.subr.bf16.mxu0 %v5339_v12  ;;  %3630 = vmatprep.subr.bf16.mxu1 %v5340_v6 }
 0x56a   :  { %3600 = vmatpush1.bf16.msra.mxu0 %v5341_v4  ;;  %3632 = vmatpush1.bf16.msra.mxu1 %v5342_v24 }
 0x56b   :  { %3634 = vmatprep.subr.bf16.mxu0 %v5343_v21  ;;  %3666 = vmatprep.subr.bf16.mxu1 %v5344_v29 }
 0x620   :  { %v1693_v59 = vpop.f32.mrb[8].mxu0  ;;  %v1764_v11 = vpop.f32.mrb[8].mxu1 }
 0x621   :  { %v2858_v36 = vmul.f32 -1.442695, %v1693_v59  ;;  %v1695_v56 = vpop.f32.mrb[9].mxu0  ;;  %v1766_v28 = vpop.f32.mrb[9].mxu1 }
 0x622   :  { %v2859_v12 = vmul.f32 -1.442695, %v1695_v56  ;;  %v2860_v6 = vmul.f32 -1.442695, %v1766_v28 }
 0x623   :  { %4103 = vpow2.f32 %v2858_v36 }
 0x624   :  { %4105 = vpow2.f32 %v2859_v12  ;;  %v5355_v12 = vld [vmem:[#allocation25_spill] sm:$0xff] }
 0x625   :  { %4107 = vpow2.f32 %v2860_v6  ;;  %v5356_v6 = vld [vmem:[#allocation26_spill] sm:$0xff] }
 0x626   :  { %4109 = vtanh.f32 %v1764_v11  ;;  %v5354_v11 = vld [vmem:[#allocation24_spill] sm:$0xff] }
 0x62d   :  { %v4104_v4 = vpop.eup %4103 }
 0x62e   :  { %v4106_v10 = vpop.eup %4105  ;;  %v1772_v24 = vadd.f32 1.0, %v4104_v4 }
 0x62f   :  { %v1778_v21 = vadd.f32 1.0, %v4106_v10  ;;  %v4108_v37 = vpop.eup %4107  ;;  %v5349_v10 = vld [vmem:[#allocation19_spill] sm:$0xff] }
 0x630   :  { %4111 = vrcp.f32 %v1772_v24  ;;  %v4110_v29 = vpop.eup %4109  ;;  %v1785_v59 = vadd.f32 1.0, %v4108_v37  ;;  %v5350_v24 = vld [vmem:[#allocation20_spill] sm:$0xff]  ;;  %v5357_v37 = vld [vmem:[#allocation27_spill] sm:$0xff] }
 0x631   :  { %4113 = vrcp.f32 %v1778_v21  ;;  %v5351_v21 = vld [vmem:[#allocation21_spill] sm:$0xff] }
 0x632   :  { %4115 = vrcp.f32 %v1785_v59  ;;  %v5358_v59 = vld [vmem:[#allocation28_spill] sm:$0xff] }
 0x63a   :  { %v4112_v46 = vpop.eup %4111 }
 0x63b   :  { %v4114_v58 = vpop.eup %4113  ;;  %v1789_v55 = vmul.f32 %v4112_v46, %v4110_v29  ;;  %v5352_v29 = vld [vmem:[#allocation22_spill] sm:$0xff]  ;;  %v5353_v46 = vld [vmem:[#allocation23_spill] sm:$0xff] }
 0x63c   :  { %v1788_v54 = vmul.f32 %v4114_v58, %v4865_v49  ;;  %v4116_v28 = vpop.eup %4115  ;;  %v237_v49 = vpop.permute.xlu0 %236  ;;  %v5348_v58 = vld [vmem:[#allocation18_spill] sm:$0xff] }
 0x63d   :  { %vm238_vm5 = vcmp.eq.s32.totalorder %v237_v49, %v4595_v61  ;;  %v5362_v49 = vld [vmem:[#allocation32_spill] sm:$0xff] }
 0x63e   :  { %v4941_v56 = vadd.f32 %v1789_v55, %v1788_v54  ;;  %v5346_v54 = vld [vmem:[#allocation16_spill] sm:$0xff]  ;;  %v5347_v55 = vld [vmem:[#allocation17_spill] sm:$0xff] }
 0x640   :  { %4117 = vtanh.f32 %v4941_v56 }
 0x64a   :  { %v4118_v36 = vpop.eup %4117 }
 0x64b   :  { %v1792_v4 = vmul.f32 %v4118_v36, %v4116_v28  ;;  %v5359_v28 = vld [vmem:[#allocation29_spill] sm:$0xff]  ;;  %v5360_v36 = vld [vmem:[#allocation30_spill] sm:$0xff] }
 0x64d   :  { %1858 = vmatmul.mubr.f32.vlgmr.msra.gmra.mrb[10].mxu0 %v1792_v4  ;;  %1929 = vmatmul.mubr.f32.vlgmr.msra.gmra.mrb[10].mxu1 %v1792_v4  ;;  %v5361_v4 = vld [vmem:[#allocation31_spill] sm:$0xff] }
 0x64e   :  { %3636 = vmatpush1.bf16.msra.mxu0 %v4497_v16  ;;  %3668 = vmatpush1.bf16.msra.mxu1 %v4499_v17 }
 0x64f   :  { %3638 = vmatprep.subr.bf16.mxu0 %v4503_v25  ;;  %3670 = vmatprep.subr.bf16.mxu1 %v4505_v26 }
 0x650   :  { %1999 = vmatprep.mubr.f32.mxu0 %v5257_v7  ;;  %2070 = vmatprep.mubr.f32.mxu1 %v5257_v7 }
 0x652   :  { %3640 = vmatpush1.bf16.msra.mxu0 %v4511_v42  ;;  %3672 = vmatpush1.bf16.msra.mxu1 %v4513_v43 }
 0x653   :  { %3642 = vmatprep.subr.bf16.mxu0 %v4517_v50  ;;  %3674 = vmatprep.subr.bf16.mxu1 %v5258_v2 }
 0x656   :  { %3644 = vmatpush1.bf16.msra.mxu0 %v5259_v38  ;;  %3676 = vmatpush1.bf16.msra.mxu1 %v5260_v39 }
 0x657   :  { %3646 = vmatprep.subr.bf16.mxu0 %v5261_v44  ;;  %3678 = vmatprep.subr.bf16.mxu1 %v5262_v47 }
 0x65a   :  { %3648 = vmatpush1.bf16.msra.mxu0 %v5263_v57  ;;  %3680 = vmatpush1.bf16.msra.mxu1 %v5264_v62 }
 0x65b   :  { %3650 = vmatprep.subr.bf16.mxu0 %v5265_v63  ;;  %3682 = vmatprep.subr.bf16.mxu1 %v5266_v15 }
 0x65e   :  { %3652 = vmatpush1.bf16.msra.mxu0 %v5267_v48  ;;  %3684 = vmatpush1.bf16.msra.mxu1 %v5268_v60 }
 0x65f   :  { %3654 = vmatprep.subr.bf16.mxu0 %v4555_v34  ;;  %3686 = vmatprep.subr.bf16.mxu1 %v4557_v35 }
 0x662   :  { %3656 = vmatpush1.bf16.msra.mxu0 %v4561_v52  ;;  %3688 = vmatpush1.bf16.msra.mxu1 %v4563_v53 }
 0x663   :  { %3658 = vmatprep.subr.bf16.mxu0 %v4567_v1  ;;  %3690 = vmatprep.subr.bf16.mxu1 %v4569_v51 }
 0x666   :  { %3660 = vmatpush1.bf16.msra.mxu0 %v4573_v30  ;;  %3692 = vmatpush1.bf16.msra.mxu1 %v4575_v31 }
 0x667   :  { %3662 = vmatprep.subr.bf16.mxu0 %v4579_v19  ;;  %3694 = vmatprep.subr.bf16.mxu1 %v4581_v20 }
 0x66a   :  { %3664 = vmatpush1.bf16.msra.mxu0 %v4585_v0  ;;  %3696 = vmatpush1.bf16.msra.mxu1 %v4587_v3 }
 0x66b   :  { %3698 = vmatprep.subr.bf16.mxu0 %v4396_v5  ;;  %3730 = vmatprep.subr.bf16.mxu1 %v4398_v9 }
 0x66d   :  { %2861 = vmatmul.mubr.msk.f32.vlgmr.msra.gmra.mrb[10].mxu0 %vm238_vm5, %v5269_v8  ;;  %2862 = vmatmul.mubr.msk.f32.vlgmr.msra.gmra.mrb[10].mxu1 %vm238_vm5, %v5269_v8 }
 0x66e   :  { %3700 = vmatpush1.bf16.msra.mxu0 %v4401_v13  ;;  %3732 = vmatpush1.bf16.msra.mxu1 %v4403_v14 }
 0x66f   :  { %3702 = vmatprep.subr.bf16.mxu0 %v4406_v18  ;;  %3734 = vmatprep.subr.bf16.mxu1 %v4410_v22 }
 0x670   :  { %2165 = vmatprep.mubr.f32.mxu0 %v5257_v7  ;;  %2236 = vmatprep.mubr.f32.mxu1 %v5257_v7 }
 0x672   :  { %3704 = vmatpush1.bf16.msra.mxu0 %v4412_v23  ;;  %3736 = vmatpush1.bf16.msra.mxu1 %v4415_v27 }
 0x673   :  { %3706 = vmatprep.subr.bf16.mxu0 %v4418_v32  ;;  %3738 = vmatprep.subr.bf16.mxu1 %v4420_v33 }
 0x676   :  { %3708 = vmatpush1.bf16.msra.mxu0 %v4425_v40  ;;  %3740 = vmatpush1.bf16.msra.mxu1 %v4427_v41 }
 0x677   :  { %3710 = vmatprep.subr.bf16.mxu0 %v4431_v45  ;;  %3742 = vmatprep.subr.bf16.mxu1 %v5346_v54 }
 0x67a   :  { %3712 = vmatpush1.bf16.msra.mxu0 %v5347_v55  ;;  %3744 = vmatpush1.bf16.msra.mxu1 %v5348_v58 }
 0x67b   :  { %3714 = vmatprep.subr.bf16.mxu0 %v5349_v10  ;;  %3746 = vmatprep.subr.bf16.mxu1 %v5350_v24 }
 0x67e   :  { %3716 = vmatpush1.bf16.msra.mxu0 %v5351_v21  ;;  %3748 = vmatpush1.bf16.msra.mxu1 %v5352_v29  ;;  %v5363_v29 = vld [vmem:[#allocation33_spill] sm:$0xff] }
 0x67f   :  { %3718 = vmatprep.subr.bf16.mxu0 %v5353_v46  ;;  %3750 = vmatprep.subr.bf16.mxu1 %v5354_v11  ;;  %v5364_v46 = vld [vmem:[#allocation34_spill] sm:$0xff]  ;;  %v5365_v11 = vld [vmem:[#allocation35_spill] sm:$0xff] }
 0x682   :  { %3720 = vmatpush1.bf16.msra.mxu0 %v5355_v12  ;;  %3752 = vmatpush1.bf16.msra.mxu1 %v5356_v6  ;;  %v5366_v12 = vld [vmem:[#allocation36_spill] sm:$0xff]  ;;  %v4303_v6 = vmov 7  }
 0x683   :  { %3722 = vmatprep.subr.bf16.mxu0 %v5357_v37  ;;  %3754 = vmatprep.subr.bf16.mxu1 %v5358_v59  ;;  %v5367_v59 = vld [vmem:[#allocation37_spill] sm:$0xff] }
 0x684   :  { %4037 = vset.pattern.permute.xlu1 %v4303_v6  ;;  %4038 = vset.pattern.permute.xlu0 %v4303_v6 }
 0x685   :  { %248 = vperm.xlu1 %4037, %v5367_v59  }
 0x686   :  { %3724 = vmatpush1.bf16.msra.mxu0 %v5359_v28  ;;  %3756 = vmatpush1.bf16.msra.mxu1 %v5360_v36 }
 0x687   :  { %3726 = vmatprep.subr.bf16.mxu0 %v5361_v4  ;;  %3758 = vmatprep.subr.bf16.mxu1 %v5362_v49 }
 0x68a   :  { %3728 = vmatpush1.bf16.msra.mxu0 %v5363_v29  ;;  %3760 = vmatpush1.bf16.msra.mxu1 %v5364_v46 }
 0x68b   :  { %3762 = vmatprep.subr.bf16.mxu0 %v5365_v11  ;;  %3794 = vmatprep.subr.bf16.mxu1 %v5366_v12 }
 0x740   :  { %v2001_v28 = vpop.f32.mrb[10].mxu0  ;;  %v2072_v37 = vpop.f32.mrb[10].mxu1 }
 0x741   :  { %v2863_v36 = vmul.f32 -1.442695, %v2001_v28  ;;  %v2003_v21 = vpop.f32.mrb[11].mxu0  ;;  %v2074_v4 = vpop.f32.mrb[11].mxu1 }
 0x742   :  { %v2864_v24 = vmul.f32 -1.442695, %v2003_v21  ;;  %v2865_v29 = vmul.f32 -1.442695, %v2074_v4 }
 0x743   :  { %4119 = vpow2.f32 %v2863_v36 }
 0x744   :  { %4121 = vpow2.f32 %v2864_v24 }
 0x745   :  { %4123 = vpow2.f32 %v2865_v29 }
 0x746   :  { %4125 = vtanh.f32 %v2072_v37  ;;  %v5388_v37 = vld [vmem:[#allocation36_spill] sm:$0xff] }
 0x74d   :  { %v4120_v49 = vpop.eup %4119 }
 0x74e   :  { %v4122_v46 = vpop.eup %4121  ;;  %v2080_v10 = vadd.f32 1.0, %v4120_v49 }
 0x74f   :  { %v2086_v12 = vadd.f32 1.0, %v4122_v46  ;;  %v4124_v6 = vpop.eup %4123  ;;  %v5385_v46 = vld [vmem:[#allocation33_spill] sm:$0xff] }
 0x750   :  { %4127 = vrcp.f32 %v2080_v10  ;;  %v4126_v11 = vpop.eup %4125  ;;  %v2093_v28 = vadd.f32 1.0, %v4124_v6  ;;  %v5384_v10 = vld [vmem:[#allocation32_spill] sm:$0xff] }
 0x751   :  { %4129 = vrcp.f32 %v2086_v12  ;;  %v5387_v12 = vld [vmem:[#allocation35_spill] sm:$0xff] }
 0x752   :  { %4131 = vrcp.f32 %v2093_v28 }
 0x75a   :  { %v4128_v59 = vpop.eup %4127 }
 0x75b   :  { %v4130_v58 = vpop.eup %4129  ;;  %v2097_v55 = vmul.f32 %v4128_v59, %v4126_v11  ;;  %v5386_v11 = vld [vmem:[#allocation34_spill] sm:$0xff] }
 0x75c   :  { %v2096_v54 = vmul.f32 %v4130_v58, %v4941_v56  ;;  %v4132_v24 = vpop.eup %4131  ;;  %v243_v56 = vpop.permute.xlu1 %242  ;;  %v5383_v58 = vld [vmem:[#allocation31_spill] sm:$0xff] }
 0x75d   :  { %vm244_vm6 = vcmp.eq.s32.totalorder %v243_v56, %v4595_v61 }
 0x75e   :  { %v5017_v21 = vadd.f32 %v2097_v55, %v2096_v54  ;;  %v5381_v54 = vld [vmem:[#allocation29_spill] sm:$0xff]  ;;  %v5382_v55 = vld [vmem:[#allocation30_spill] sm:$0xff] }
 0x760   :  { %4133 = vtanh.f32 %v5017_v21 }
 0x76a   :  { %v4134_v36 = vpop.eup %4133 }
 0x76b   :  { %v2100_v29 = vmul.f32 %v4134_v36, %v4132_v24 }
 0x76d   :  { %2166 = vmatmul.mubr.f32.vlgmr.msra.gmra.mrb[12].mxu0 %v2100_v29  ;;  %2237 = vmatmul.mubr.f32.vlgmr.msra.gmra.mrb[12].mxu1 %v2100_v29 }
 0x76e   :  { %3764 = vmatpush1.bf16.msra.mxu0 %v4497_v16  ;;  %3796 = vmatpush1.bf16.msra.mxu1 %v4499_v17 }
 0x76f   :  { %3766 = vmatprep.subr.bf16.mxu0 %v4503_v25  ;;  %3798 = vmatprep.subr.bf16.mxu1 %v4505_v26 }
 0x770   :  { %2307 = vmatprep.mubr.f32.mxu0 %v5257_v7  ;;  %2378 = vmatprep.mubr.f32.mxu1 %v5257_v7 }
 0x772   :  { %3768 = vmatpush1.bf16.msra.mxu0 %v4511_v42  ;;  %3800 = vmatpush1.bf16.msra.mxu1 %v4513_v43 }
 0x773   :  { %3770 = vmatprep.subr.bf16.mxu0 %v4517_v50  ;;  %3802 = vmatprep.subr.bf16.mxu1 %v5258_v2 }
 0x776   :  { %3772 = vmatpush1.bf16.msra.mxu0 %v5259_v38  ;;  %3804 = vmatpush1.bf16.msra.mxu1 %v5260_v39 }
 0x777   :  { %3774 = vmatprep.subr.bf16.mxu0 %v5261_v44  ;;  %3806 = vmatprep.subr.bf16.mxu1 %v5262_v47 }
 0x77a   :  { %3776 = vmatpush1.bf16.msra.mxu0 %v5263_v57  ;;  %3808 = vmatpush1.bf16.msra.mxu1 %v5264_v62 }
 0x77b   :  { %3778 = vmatprep.subr.bf16.mxu0 %v5265_v63  ;;  %3810 = vmatprep.subr.bf16.mxu1 %v5266_v15 }
 0x77e   :  { %3780 = vmatpush1.bf16.msra.mxu0 %v5267_v48  ;;  %3812 = vmatpush1.bf16.msra.mxu1 %v5268_v60 }
 0x77f   :  { %3782 = vmatprep.subr.bf16.mxu0 %v4555_v34  ;;  %3814 = vmatprep.subr.bf16.mxu1 %v4557_v35 }
 0x782   :  { %3784 = vmatpush1.bf16.msra.mxu0 %v4561_v52  ;;  %3816 = vmatpush1.bf16.msra.mxu1 %v4563_v53 }
 0x783   :  { %3786 = vmatprep.subr.bf16.mxu0 %v4567_v1  ;;  %3818 = vmatprep.subr.bf16.mxu1 %v4569_v51 }
 0x786   :  { %3788 = vmatpush1.bf16.msra.mxu0 %v4573_v30  ;;  %3820 = vmatpush1.bf16.msra.mxu1 %v4575_v31 }
 0x787   :  { %3790 = vmatprep.subr.bf16.mxu0 %v4579_v19  ;;  %3822 = vmatprep.subr.bf16.mxu1 %v4581_v20 }
 0x78a   :  { %3792 = vmatpush1.bf16.msra.mxu0 %v4585_v0  ;;  %3824 = vmatpush1.bf16.msra.mxu1 %v4587_v3 }
 0x78b   :  { %3826 = vmatprep.subr.bf16.mxu0 %v4396_v5  ;;  %3858 = vmatprep.subr.bf16.mxu1 %v4398_v9  ;;  %v5368_v5 = vld [vmem:[#allocation16_spill] sm:$0xff]  ;;  %v5369_v9 = vld [vmem:[#allocation17_spill] sm:$0xff] }
 0x78d   :  { %2866 = vmatmul.mubr.msk.f32.vlgmr.msra.gmra.mrb[12].mxu0 %vm244_vm6, %v5269_v8  ;;  %2867 = vmatmul.mubr.msk.f32.vlgmr.msra.gmra.mrb[12].mxu1 %vm244_vm6, %v5269_v8 }
 0x78e   :  { %3828 = vmatpush1.bf16.msra.mxu0 %v4401_v13  ;;  %3860 = vmatpush1.bf16.msra.mxu1 %v4403_v14  ;;  %v5370_v13 = vld [vmem:[#allocation18_spill] sm:$0xff]  ;;  %v5371_v14 = vld [vmem:[#allocation19_spill] sm:$0xff] }
 0x78f   :  { %3830 = vmatprep.subr.bf16.mxu0 %v4406_v18  ;;  %3862 = vmatprep.subr.bf16.mxu1 %v4410_v22  ;;  %v5372_v18 = vld [vmem:[#allocation20_spill] sm:$0xff]  ;;  %v5373_v22 = vld [vmem:[#allocation21_spill] sm:$0xff] }
 0x790   :  { %2473 = vmatprep.mubr.f32.mxu0 %v5257_v7  ;;  %2544 = vmatprep.mubr.f32.mxu1 %v5257_v7 }
 0x792   :  { %3832 = vmatpush1.bf16.msra.mxu0 %v4412_v23  ;;  %3864 = vmatpush1.bf16.msra.mxu1 %v4415_v27  ;;  %v5374_v23 = vld [vmem:[#allocation22_spill] sm:$0xff]  ;;  %v5375_v27 = vld [vmem:[#allocation23_spill] sm:$0xff] }
 0x793   :  { %3834 = vmatprep.subr.bf16.mxu0 %v4418_v32  ;;  %3866 = vmatprep.subr.bf16.mxu1 %v4420_v33  ;;  %v5376_v32 = vld [vmem:[#allocation24_spill] sm:$0xff]  ;;  %v5377_v33 = vld [vmem:[#allocation25_spill] sm:$0xff] }
 0x796   :  { %3836 = vmatpush1.bf16.msra.mxu0 %v4425_v40  ;;  %3868 = vmatpush1.bf16.msra.mxu1 %v4427_v41  ;;  %v5378_v40 = vld [vmem:[#allocation26_spill] sm:$0xff]  ;;  %v5379_v41 = vld [vmem:[#allocation27_spill] sm:$0xff] }
 0x797   :  { %3838 = vmatprep.subr.bf16.mxu0 %v4431_v45  ;;  %3870 = vmatprep.subr.bf16.mxu1 %v5368_v5  ;;  %v5380_v45 = vld [vmem:[#allocation28_spill] sm:$0xff] }
 0x79a   :  { %3840 = vmatpush1.bf16.msra.mxu0 %v5369_v9  ;;  %3872 = vmatpush1.bf16.msra.mxu1 %v5370_v13 }
 0x79b   :  { %3842 = vmatprep.subr.bf16.mxu0 %v5371_v14  ;;  %3874 = vmatprep.subr.bf16.mxu1 %v5372_v18 }
 0x79e   :  { %3844 = vmatpush1.bf16.msra.mxu0 %v5373_v22  ;;  %3876 = vmatpush1.bf16.msra.mxu1 %v5374_v23 }
 0x79f   :  { %3846 = vmatprep.subr.bf16.mxu0 %v5375_v27  ;;  %3878 = vmatprep.subr.bf16.mxu1 %v5376_v32 }
 0x7a2   :  { %3848 = vmatpush1.bf16.msra.mxu0 %v5377_v33  ;;  %3880 = vmatpush1.bf16.msra.mxu1 %v5378_v40 }
 0x7a3   :  { %3850 = vmatprep.subr.bf16.mxu0 %v5379_v41  ;;  %3882 = vmatprep.subr.bf16.mxu1 %v5380_v45 }
 0x7a6   :  { %3852 = vmatpush1.bf16.msra.mxu0 %v5381_v54  ;;  %3884 = vmatpush1.bf16.msra.mxu1 %v5382_v55 }
 0x7a7   :  { %3854 = vmatprep.subr.bf16.mxu0 %v5383_v58  ;;  %3886 = vmatprep.subr.bf16.mxu1 %v5384_v10 }
 0x7aa   :  { %3856 = vmatpush1.bf16.msra.mxu0 %v5385_v46  ;;  %3888 = vmatpush1.bf16.msra.mxu1 %v5386_v11 }
 0x7ab   :  { %3890 = vmatprep.subr.bf16.mxu0 %v5387_v12  ;;  %3922 = vmatprep.subr.bf16.mxu1 %v5388_v37 }
 0x860   :  { %v2309_v4 = vpop.f32.mrb[12].mxu0  ;;  %v2380_v49 = vpop.f32.mrb[12].mxu1 }
 0x861   :  { %v2868_v6 = vmul.f32 -1.442695, %v2309_v4  ;;  %v2311_v59 = vpop.f32.mrb[13].mxu0  ;;  %v2382_v28 = vpop.f32.mrb[13].mxu1 }
 0x862   :  { %v2869_v24 = vmul.f32 -1.442695, %v2311_v59  ;;  %v2870_v36 = vmul.f32 -1.442695, %v2382_v28 }
 0x863   :  { %4135 = vpow2.f32 %v2868_v6 }
 0x864   :  { %4137 = vpow2.f32 %v2869_v24 }
 0x865   :  { %4139 = vpow2.f32 %v2870_v36  ;;  %v2876_v36 = vld [vmem:[%s5151_s4] ss:$0 sm:$0xff] }
 0x866   :  { %4141 = vtanh.f32 %v2380_v49 }
 0x86d   :  { %v4136_v29 = vpop.eup %4135 }
 0x86e   :  { %v4138_v56 = vpop.eup %4137  ;;  %v2388_v5 = vadd.f32 1.0, %v4136_v29 }
 0x86f   :  { %v2394_v9 = vadd.f32 1.0, %v4138_v56  ;;  %v4140_v13 = vpop.eup %4139 }
 0x870   :  { %4143 = vrcp.f32 %v2388_v5  ;;  %v4142_v14 = vpop.eup %4141  ;;  %v2401_v27 = vadd.f32 1.0, %v4140_v13 }
 0x871   :  { %4145 = vrcp.f32 %v2394_v9 }
 0x872   :  { %4147 = vrcp.f32 %v2401_v27 }
 0x87a   :  { %v4144_v18 = vpop.eup %4143 }
 0x87b   :  { %v4146_v22 = vpop.eup %4145  ;;  %v2405_v23 = vmul.f32 %v4144_v18, %v4142_v14 }
 0x87c   :  { %v2404_v32 = vmul.f32 %v4146_v22, %v5017_v21  ;;  %v4148_v40 = vpop.eup %4147 }
 0x87e   :  { %v5092_v33 = vadd.f32 %v2405_v23, %v2404_v32 }
 0x880   :  { %4149 = vtanh.f32 %v5092_v33 }
 0x88a   :  { %v4150_v41 = vpop.eup %4149 }
 0x88b   :  { %v2408_v45 = vmul.f32 %v4150_v41, %v4148_v40 }
 0x88d   :  { %2474 = vmatmul.mubr.f32.vlgmr.msra.gmra.mrb[14].mxu0 %v2408_v45  ;;  %2545 = vmatmul.mubr.f32.vlgmr.msra.gmra.mrb[14].mxu1 %v2408_v45 }
 0x88e   :  { %3892 = vmatpush1.bf16.msra.mxu0 %v4497_v16  ;;  %3924 = vmatpush1.bf16.msra.mxu1 %v4499_v17  ;;  %v249_v16 = vpop.permute.xlu1 %248  ;;  %v2717_v17 = vld [vmem:[#allocation8] sm:$0xff] }
 0x88f   :  { %3894 = vmatprep.subr.bf16.mxu0 %v4503_v25  ;;  %3926 = vmatprep.subr.bf16.mxu1 %v4505_v26  ;;  %vm250_vm7 = vcmp.eq.s32.totalorder %v249_v16, %v4595_v61  ;;  %v2718_v25 = vld [vmem:[#allocation8 + $0x8] sm:$0xff]  ;;  %v2729_v61 = vld [vmem:[#allocation8 + $0x60] sm:$0xff] }
 0x890   :  { %2615 = vmatprep.mubr.f32.mxu0 %v5257_v7  ;;  %2686 = vmatprep.mubr.f32.mxu1 %v5257_v7  ;;  %v3954_v26 = vpack.c.bf16 %v2718_v25, %v2717_v17 }
 0x892   :  { %3896 = vmatpush1.bf16.msra.mxu0 %v4511_v42  ;;  %3928 = vmatpush1.bf16.msra.mxu1 %v4513_v43  ;;  %v4304_v42 = vmov 0.0|0.0   ;;  %v2719_v43 = vld [vmem:[#allocation8 + $0x10] sm:$0xff] }
 0x893   :  { %3898 = vmatprep.subr.bf16.mxu0 %v4517_v50  ;;  %3930 = vmatprep.subr.bf16.mxu1 %v5258_v2  ;;  %v2720_v50 = vld [vmem:[#allocation8 + $0x18] sm:$0xff] }
 0x896   :  { %3900 = vmatpush1.bf16.msra.mxu0 %v5259_v38  ;;  %3932 = vmatpush1.bf16.msra.mxu1 %v5260_v39  ;;  %v2730_v38 = vld [vmem:[#allocation8 + $0x68] sm:$0xff] }
 0x897   :  { %3902 = vmatprep.subr.bf16.mxu0 %v5261_v44  ;;  %3934 = vmatprep.subr.bf16.mxu1 %v5262_v47  ;;  %v3972_v39 = vpack.c.bf16 %v2730_v38, %v2729_v61  ;;  %v2731_v44 = vld [vmem:[#allocation8 + $0x70] sm:$0xff]  ;;  %v2732_v47 = vld [vmem:[#allocation8 + $0x78] sm:$0xff] }
 0x89a   :  { %3904 = vmatpush1.bf16.msra.mxu0 %v5263_v57  ;;  %3936 = vmatpush1.bf16.msra.mxu1 %v5264_v62  ;;  %v3975_v57 = vpack.c.bf16 %v2732_v47, %v2731_v44 }
 0x89b   :  { %3906 = vmatprep.subr.bf16.mxu0 %v5265_v63  ;;  %3938 = vmatprep.subr.bf16.mxu1 %v5266_v15 }
 0x89e   :  { %3908 = vmatpush1.bf16.msra.mxu0 %v5267_v48  ;;  %3940 = vmatpush1.bf16.msra.mxu1 %v5268_v60 }
 0x89f   :  { %3910 = vmatprep.subr.bf16.mxu0 %v4555_v34  ;;  %3942 = vmatprep.subr.bf16.mxu1 %v4557_v35  ;;  %v3957_v34 = vpack.c.bf16 %v2720_v50, %v2719_v43  ;;  %v2721_v35 = vld [vmem:[#allocation8 + $0x20] sm:$0xff] }
 0x8a2   :  { %3912 = vmatpush1.bf16.msra.mxu0 %v4561_v52  ;;  %3944 = vmatpush1.bf16.msra.mxu1 %v4563_v53  ;;  %v2722_v52 = vld [vmem:[#allocation8 + $0x28] sm:$0xff] }
 0x8a3   :  { %3914 = vmatprep.subr.bf16.mxu0 %v4567_v1  ;;  %3946 = vmatprep.subr.bf16.mxu1 %v4569_v51  ;;  %v3960_v53 = vpack.c.bf16 %v2722_v52, %v2721_v35  ;;  %v2723_v1 = vld [vmem:[#allocation8 + $0x30] sm:$0xff]  ;;  %v2724_v51 = vld [vmem:[#allocation8 + $0x38] sm:$0xff] }
 0x8a6   :  { %3916 = vmatpush1.bf16.msra.mxu0 %v4573_v30  ;;  %3948 = vmatpush1.bf16.msra.mxu1 %v4575_v31  ;;  %v3963_v30 = vpack.c.bf16 %v2724_v51, %v2723_v1  ;;  %v2725_v31 = vld [vmem:[#allocation8 + $0x40] sm:$0xff] }
 0x8a7   :  { %3918 = vmatprep.subr.bf16.mxu0 %v4579_v19  ;;  %3950 = vmatprep.subr.bf16.mxu1 %v4581_v20  ;;  %v2726_v19 = vld [vmem:[#allocation8 + $0x48] sm:$0xff] }
 0x8a8   :  { %v3966_v20 = vpack.c.bf16 %v2726_v19, %v2725_v31 }
 0x8aa   :  { %3920 = vmatpush1.bf16.msra.mxu0 %v4585_v0  ;;  %3952 = vmatpush1.bf16.msra.mxu1 %v4587_v3  ;;  %v2727_v0 = vld [vmem:[#allocation8 + $0x50] sm:$0xff]  ;;  %v2728_v3 = vld [vmem:[#allocation8 + $0x58] sm:$0xff] }
 0x8ab   :  { %3953 = vmatprep.subr.bf16.mxu0 %v4304_v42  ;;  %v3969_v2 = vpack.c.bf16 %v2728_v3, %v2727_v0 }
 0x8ad   :  { %2871 = vmatmul.mubr.msk.f32.vlgmr.msra.gmra.mrb[14].mxu0 %vm250_vm7, %v5269_v8  ;;  %2872 = vmatmul.mubr.msk.f32.vlgmr.msra.gmra.mrb[14].mxu1 %vm250_vm7, %v5269_v8 }
 0x8ae   :  { %3955 = vmatpush3.bf16.msra.mxu0 %v3954_v26  ;;  %2926 = vmatprep.mubr.msk.f32.mxu0 %vm4305_vm8, %v5257_v7 }
 0x8af   :  { %3956 = vmatprep.subr.bf16.mxu0 %v4304_v42 }
 0x8b2   :  { %3958 = vmatpush3.bf16.msra.mxu0 %v3957_v34 }
 0x8b3   :  { %3959 = vmatprep.subr.bf16.mxu0 %v4304_v42 }
 0x8b6   :  { %3961 = vmatpush3.bf16.msra.mxu0 %v3960_v53 }
 0x8b7   :  { %3962 = vmatprep.subr.bf16.mxu0 %v4304_v42 }
 0x8ba   :  { %3964 = vmatpush3.bf16.msra.mxu0 %v3963_v30 }
 0x8bb   :  { %3965 = vmatprep.subr.bf16.mxu0 %v4304_v42 }
 0x8be   :  { %3967 = vmatpush3.bf16.msra.mxu0 %v3966_v20 }
 0x8bf   :  { %3968 = vmatprep.subr.bf16.mxu0 %v4304_v42 }
 0x8c2   :  { %3970 = vmatpush3.bf16.msra.mxu0 %v3969_v2 }
 0x8c3   :  { %3971 = vmatprep.subr.bf16.mxu0 %v4304_v42 }
 0x8c6   :  { %3973 = vmatpush3.bf16.msra.mxu0 %v3972_v39 }
 0x8c7   :  { %3974 = vmatprep.subr.bf16.mxu0 %v4304_v42 }
 0x8ca   :  { %3976 = vmatpush3.bf16.msra.mxu0 %v3975_v57 }
 0x980   :  { %v2617_v62 = vpop.f32.mrb[14].mxu0  ;;  %v2688_v63 = vpop.f32.mrb[14].mxu1 }
 0x981   :  { %v2873_v15 = vmul.f32 -1.442695, %v2617_v62  ;;  %v2619_v48 = vpop.f32.mrb[15].mxu0  ;;  %v2690_v60 = vpop.f32.mrb[15].mxu1 }
 0x982   :  { %v2874_v8 = vmul.f32 -1.442695, %v2619_v48  ;;  %v2875_v21 = vmul.f32 -1.442695, %v2690_v60 }
 0x983   :  { %4151 = vpow2.f32 %v2873_v15 }
 0x984   :  { %4153 = vpow2.f32 %v2874_v8 }
 0x985   :  { %4155 = vpow2.f32 %v2875_v21 }
 0x986   :  { %4157 = vtanh.f32 %v2688_v63 }
 0x98d   :  { %v4152_v54 = vpop.eup %4151 }
 0x98e   :  { %v4154_v7 = vpop.eup %4153  ;;  %v2696_v55 = vadd.f32 1.0, %v4152_v54 }
 0x98f   :  { %v2702_v58 = vadd.f32 1.0, %v4154_v7  ;;  %v4156_v10 = vpop.eup %4155 }
 0x990   :  { %4159 = vrcp.f32 %v2696_v55  ;;  %v4158_v46 = vpop.eup %4157  ;;  %v2709_v4 = vadd.f32 1.0, %v4156_v10 }
 0x991   :  { %4161 = vrcp.f32 %v2702_v58 }
 0x992   :  { %4163 = vrcp.f32 %v2709_v4 }
 0x99a   :  { %v4160_v11 = vpop.eup %4159 }
 0x99b   :  { %v4162_v12 = vpop.eup %4161  ;;  %v2713_v37 = vmul.f32 %v4160_v11, %v4158_v46 }
 0x99c   :  { %v2712_v49 = vmul.f32 %v4162_v12, %v5092_v33  ;;  %v4164_v59 = vpop.eup %4163 }
 0x99e   :  { %v2714_v6 = vadd.f32 %v2713_v37, %v2712_v49 }
 0x9a0   :  { %4165 = vtanh.f32 %v2714_v6 }
 0x9aa   :  { %v4166_v28 = vpop.eup %4165 }
 0x9ab   :  { %v2716_v24 = vmul.f32 %v4166_v28, %v4164_v59 }
 0x9ad   :  { %2927 = vmatmul.mubr.f32.vlgmr.msra.gmra.mrb[16].mxu0 %v2716_v24 }
 0xa80   :  { %v2806_v29 = vpop.f32.mrb[16].mxu0 }
 0xa81   :  { %v2807_v56 = vadd.f32 %v2876_v36, %v2806_v29  ;;  %v2928_v5 = vpop.f32.mrb[17].mxu0 }
 0xa83   :  { %2810 = vst [vmem:[#allocation10] sm:$0xff] %v2807_v56 }
 0xa84   :  { %4267 = shalt.err (!%p4264_p8)
}
 0xa85   :  { %s4268_s22 = scalar_lea.hbm %s5152_s5, 128 }
 0xa86   :  { %p4269_p9 = scmp.ne.s32.totalorder %s5152_s5, %s4268_s22  ;;  %p4272_p10 = scmp.lt.u32.totalorder %s4268_s22, %s5152_s5 }
 0xa88   :  { %p4274_p11 = pnand %p4272_p10, %p4269_p9 }
 0xa8a   :  { %4277 = shalt.err (!%p4274_p11)
}
 0xa8b   :  { %2820 = dma.vmem_to_hbm [thread:$0]  %s2818_s18, 128, %s5152_s5, [#allocation4]  }
 0xa8c   :  { %4284 = dma.done.wait [#allocation4], 128  }
 0xa8d   :  { %4285 = vsyncadd [#allocation4], 4294967168 }
 0xa8e   :  { %2824 = vsyncpa [#allocation3], 1 }
 0xa8f   :  { %2825 = vsyncpa [#allocation6], 1 }
 0xa90   :  { %2826 = vsyncpa [#allocation9], 1 }
 0xa91   :  { %2827 = vsyncpa [#allocation4], 1 }

</bundles_post_ra>
